<compile_context>
chip_gen: v7x
topology: tpu7x:2x2x1
jax: 0.10.0
libtpu: 0.0.40
codegen_flags: <defaults>
</compile_context>

<pallas_src>
import functools

import jax
import jax.numpy as jnp
from jax import lax
from jax.experimental import pallas as pl
from jax.experimental.pallas import tpu as pltpu


def _round_up(x, m):
    return (x + m - 1) // m * m


# ---------------------------------------------------------------------------
# Serial GRU recurrence with the input projection fused in.
# ---------------------------------------------------------------------------
def _gru_kernel(x_ref, m_ref, h0_ref, wi_ref, wh_ref, bi_ref, bhn_ref,
                y_ref, hout_ref, *, tc, t_real, t_pad, h_pad, gate_dtype):
    c = pl.program_id(1)          # time-chunk index (serial axis)

    # The hout block's index map ignores the time axis, so it stays resident
    # in VMEM across all time chunks of a batch block: use it as the carry.
    @pl.when(c == 0)
    def _():
        hout_ref[...] = h0_ref[...]

    wi = wi_ref[...]                          # (D, 3*H_pad)      mxu dtype
    wh = wh_ref[...]                          # (H_pad, 3*H_pad)  mxu dtype
    bi = bi_ref[...].astype(jnp.float32)      # (1, 3*H_pad)  input-side biases
    bhn = bhn_ref[...].astype(gate_dtype)     # (1, H_pad)    hidden-side n bias

    def step(i, h):                           # h carried in f32
        m = m_ref[i]                          # (Bc, 1) episode mask, f32
        h_m = h * m
        # Fused input projection for this timestep (no HBM xproj round trip);
        # it does not depend on h, so it can overlap the serial chain.
        xp = (jnp.dot(x_ref[i].astype(wi.dtype), wi,
                      preferred_element_type=jnp.float32)
              + bi).astype(gate_dtype)                       # (Bc, 3*H_pad)
        hp = jnp.dot(h_m.astype(wh.dtype), wh,
                     preferred_element_type=jnp.float32).astype(gate_dtype)
        # PyTorch nn.GRU gate semantics (r gates only the hidden-side n bias).
        r = jax.nn.sigmoid(xp[:, :h_pad] + hp[:, :h_pad])
        z = jax.nn.sigmoid(xp[:, h_pad:2 * h_pad] + hp[:, h_pad:2 * h_pad])
        n = jnp.tanh(xp[:, 2 * h_pad:] + r * (hp[:, 2 * h_pad:] + bhn))
        zf = z.astype(jnp.float32)
        h_new = (1.0 - zf) * n.astype(jnp.float32) + zf * h_m
        # y rows for padded tail timesteps are garbage but are sliced off by
        # the wrapper; only the carried hidden must be frozen on those steps.
        y_ref[i] = h_new.astype(y_ref.dtype)
        if t_pad != t_real:
            h_new = jnp.where(c * tc + i < t_real, h_new, h)
        return h_new

    hout_ref[...] = lax.fori_loop(0, tc, step, hout_ref[...], unroll=True)


# ---------------------------------------------------------------------------
# Parameter fusion / padding
# ---------------------------------------------------------------------------
def _fuse_params(params, hidden_dim, h_pad, mxu_dtype):
    # NOTE: under jit these pads/concats are constant-folded; for eager use
    # cache the fused weights outside the per-call path.
    (w_ir, w_iz, w_in, w_hr, w_hz, w_hn, b_r, b_z, b_in, b_hn) = params
    padc = lambda a: jnp.pad(a.astype(jnp.float32),
                             ((0, 0), (0, h_pad - hidden_dim)))
    w_i = jnp.concatenate([padc(w_ir), padc(w_iz), padc(w_in)],
                          axis=1).astype(mxu_dtype)                   # (D, 3H_pad)
    w_h = jnp.concatenate([padc(w_hr), padc(w_hz), padc(w_hn)], axis=1)
    w_h = jnp.pad(w_h, ((0, h_pad - hidden_dim), (0, 0))).astype(mxu_dtype)
    b_i = jnp.concatenate([padc(b_r), padc(b_z), padc(b_in)], axis=1)  # (1, 3H_pad)
    b_hn_p = padc(b_hn)                                                # (1, H_pad)
    return w_i, w_h, b_i, b_hn_p


def _vmem_estimate(tc, bc, d, h_pad, x_bytes, y_bytes, mxu_bytes):
    """Rough double-buffered working-set estimate for the GRU pallas_call."""
    est = 2 * tc * bc * d * x_bytes            # x blocks
    est += 2 * tc * bc * 4                     # mask blocks
    est += 2 * tc * bc * h_pad * y_bytes       # y blocks
    est += 4 * bc * h_pad * 4                  # h0 + hout blocks
    est += 2 * d * 3 * h_pad * mxu_bytes       # fused W_i
    est += 2 * h_pad * 3 * h_pad * mxu_bytes   # fused W_h
    est += 2 * 4 * h_pad * 4                   # biases
    return est


# ---------------------------------------------------------------------------
# Wrapper: GRU over (T, B, D) with per-step episode masking
# ---------------------------------------------------------------------------
def gru_forward(x_tbd, masks_tb, h0, params, *,
                tc_max=8, bc_max=256,
                mxu_dtype=jnp.float32, gate_dtype=jnp.float32):
    T, B, D = x_tbd.shape
    H = h0.shape[-1]

    H_pad = _round_up(H, 128)        # lane-dense gate slabs and y/h stores
    # TODO(synk): for tiny H (3*H <= 128) all three gates could be packed into
    # one 128-lane slab to avoid the ~4x padding overhead of per-gate padding.

    tc = max(1, min(tc_max, T))      # timesteps per grid iteration

    # Batch block: full sublanes; ensure >= 2 batch blocks when B allows so
    # the "parallel" grid axis can split across v7x's two TensorCores.
    B_pad = _round_up(B, 8)
    bc = min(_round_up(bc_max, 8), B_pad)
    if B_pad >= 16:
        bc = min(bc, max(8, _round_up(B_pad // 2, 8)))

    # Shrink tiles until the double-buffered working set fits comfortably
    # under v7x's 64 MiB physical VMEM (and v5e's tighter scoped default).
    x_bytes = jnp.dtype(x_tbd.dtype).itemsize
    y_bytes = x_bytes
    mxu_bytes = jnp.dtype(mxu_dtype).itemsize
    budget = 40 << 20
    while _vmem_estimate(tc, bc, D, H_pad, x_bytes, y_bytes, mxu_bytes) > budget:
        if tc > 1:
            tc = max(1, tc // 2)
        elif bc > 8:
            bc = max(8, bc // 2)
        else:
            break

    T_pad = _round_up(T, tc)
    B_pad = _round_up(_round_up(B, 8), bc)   # bc always divides B_pad

    est = _vmem_estimate(tc, bc, D, H_pad, x_bytes, y_bytes, mxu_bytes)
    vmem_limit = int(min(max(est * 3 // 2 + (2 << 20), 32 << 20), 48 << 20))

    w_i, w_h, b_i, b_hn = _fuse_params(params, H, H_pad, mxu_dtype)

    # Stream x in its native dtype (no extra full-array f32 cast pass).
    x_p = jnp.pad(x_tbd, ((0, T_pad - T), (0, B_pad - B), (0, 0)))
    m_p = jnp.pad(masks_tb.astype(jnp.float32),
                  ((0, T_pad - T), (0, B_pad - B)),
                  constant_values=1.0)[..., None]                  # (T_pad, B_pad, 1)
    h0_p = jnp.pad(h0.astype(jnp.float32),
                   ((0, B_pad - B), (0, H_pad - H)))

    kernel = functools.partial(_gru_kernel, tc=tc, t_real=T, t_pad=T_pad,
                               h_pad=H_pad, gate_dtype=gate_dtype)
    grid_spec = pltpu.PrefetchScalarGridSpec(
        num_scalar_prefetch=0,
        grid=(B_pad // bc, T_pad // tc),
        in_specs=[
            pl.BlockSpec((tc, bc, D), lambda b, c: (c, b, 0)),       # x
            pl.BlockSpec((tc, bc, 1), lambda b, c: (c, b, 0)),       # masks
            pl.BlockSpec((bc, H_pad), lambda b, c: (b, 0)),          # h0
            pl.BlockSpec((D, 3 * H_pad), lambda b, c: (0, 0)),       # fused W_i
            pl.BlockSpec((H_pad, 3 * H_pad), lambda b, c: (0, 0)),   # fused W_h
            pl.BlockSpec((1, 3 * H_pad), lambda b, c: (0, 0)),       # fused b_i
            pl.BlockSpec((1, H_pad), lambda b, c: (0, 0)),           # b_hn
        ],
        out_specs=[
            pl.BlockSpec((tc, bc, H_pad), lambda b, c: (c, b, 0)),   # y
            pl.BlockSpec((bc, H_pad), lambda b, c: (b, 0)),          # final hidden
        ],
    )
    y, h_out = pl.pallas_call(
        kernel,
        out_shape=(jax.ShapeDtypeStruct((T_pad, B_pad, H_pad), x_tbd.dtype),
                   jax.ShapeDtypeStruct((B_pad, H_pad), jnp.float32)),
        grid_spec=grid_spec,
        compiler_params=pltpu.CompilerParams(
            # batch blocks are independent (megacore split on v7x);
            # time is the serial recurrence.
            dimension_semantics=("parallel", "arbitrary"),
            vmem_limit_bytes=vmem_limit),
    )(x_p, m_p, h0_p, w_i, w_h, b_i, b_hn)

    return y[:T, :B, :H], h_out[:B, :H].astype(h0.dtype)


def rnn_block_forward(x, hidden, masks, params, output_dim, **kw):
    """Mirror of RnnBlock.forward dispatch (GRU cell)."""
    x_size0 = x.shape[0]
    batch_size = hidden.shape[0]
    nsteps = 1 if x_size0 == batch_size else x_size0 // batch_size
    inputs = x.reshape(nsteps, batch_size, x.shape[-1])
    if masks is None:
        m = jnp.ones((nsteps, batch_size), x.dtype)
    else:
        m = masks.reshape(nsteps, batch_size).astype(x.dtype)
    y, h_out = gru_forward(inputs, m, hidden, params, **kw)
    return y.reshape(x_size0, output_dim), h_out


# ---------------------------------------------------------------------------
# Plain-JAX reference (matches PyTorch nn.GRU + rainy masking)
# ---------------------------------------------------------------------------
def gru_reference(x_tbd, masks_tb1, h0, params):
    (w_ir, w_iz, w_in, w_hr, w_hz, w_hn, b_r, b_z, b_in, b_hn) = params

    def step(h, xm):
        x, m = xm
        h = h * m
        r = jax.nn.sigmoid(x @ w_ir + h @ w_hr + b_r)
        z = jax.nn.sigmoid(x @ w_iz + h @ w_hz + b_z)
        n = jnp.tanh(x @ w_in + b_in + r * (h @ w_hn + b_hn))
        h_new = (1.0 - z) * n + z * h
        return h_new, h_new

    h_fin, ys = jax.lax.scan(step, h0, (x_tbd, masks_tb1))
    return ys, h_fin


def init_params(key, input_dim, hidden_dim, dtype=jnp.float32):
    """Deterministic init matching PyTorch GRU's uniform(-1/sqrt(H), 1/sqrt(H))."""
    bound = 1.0 / jnp.sqrt(hidden_dim)
    keys = jax.random.split(key, 10)
    u = lambda k, shape: jax.random.uniform(k, shape, dtype, -bound, bound)
    w_ir = u(keys[0], (input_dim, hidden_dim))
    w_iz = u(keys[1], (input_dim, hidden_dim))
    w_in = u(keys[2], (input_dim, hidden_dim))
    w_hr = u(keys[3], (hidden_dim, hidden_dim))
    w_hz = u(keys[4], (hidden_dim, hidden_dim))
    w_hn = u(keys[5], (hidden_dim, hidden_dim))
    # b_r/b_z fold (b_ir+b_hr)/(b_iz+b_hz); b_in/b_hn stay separate because r
    # gates only the hidden-side bias in nn.GRU.
    b_r = u(keys[6], (1, hidden_dim))
    b_z = u(keys[7], (1, hidden_dim))
    b_in = u(keys[8], (1, hidden_dim))
    b_hn = u(keys[9], (1, hidden_dim))
    return (w_ir, w_iz, w_in, w_hr, w_hz, w_hn, b_r, b_z, b_in, b_hn)


if __name__ == "__main__":
    INPUT_DIM = 32
    HIDDEN_DIM = 32
    BATCH = 4
    NSTEPS = 8

    key = jax.random.PRNGKey(0)
    kp, kx, kh, km = jax.random.split(key, 4)
    params = init_params(kp, INPUT_DIM, HIDDEN_DIM)

    # n-step path: x packed as (nsteps * batch, input_dim), like rainy rollouts.
    x = jax.random.normal(kx, (NSTEPS * BATCH, INPUT_DIM), jnp.float32)
    hidden = jax.random.normal(kh, (BATCH, HIDDEN_DIM), jnp.float32)
    masks = (jax.random.uniform(km, (NSTEPS * BATCH,)) > 0.2).astype(jnp.float32)

    out, h_out = rnn_block_forward(x, hidden, masks, params, HIDDEN_DIM)
    out = jax.block_until_ready(out)
    h_out = jax.block_until_ready(h_out)

    x_t = x.reshape(NSTEPS, BATCH, INPUT_DIM)
    m_t = masks.reshape(NSTEPS, BATCH, 1)
    y_ref, h_ref = gru_reference(x_t, m_t, hidden, params)
    assert jnp.allclose(out, y_ref.reshape(NSTEPS * BATCH, HIDDEN_DIM),
                        atol=1e-5, rtol=1e-5)
    assert jnp.allclose(h_out, h_ref, atol=1e-5, rtol=1e-5)

    # 1-step path: x.shape[0] == hidden.shape[0]
    x1 = x[:BATCH]
    m1 = masks[:BATCH]
    out1, h_out1 = rnn_block_forward(x1, hidden, m1, params, HIDDEN_DIM)
    out1 = jax.block_until_ready(out1)
    y1_ref, h1_ref = gru_reference(x1[None], m1.reshape(1, BATCH, 1), hidden, params)
    assert jnp.allclose(out1, y1_ref[0], atol=1e-5, rtol=1e-5)
    assert jnp.allclose(h_out1, h1_ref, atol=1e-5, rtol=1e-5)

    # masks=None path + bf16 MXU operands and bf16 gate math (v6e/v7x option).
    out_bf, h_bf = rnn_block_forward(x, hidden, None, params, HIDDEN_DIM,
                                     mxu_dtype=jnp.bfloat16,
                                     gate_dtype=jnp.bfloat16)
    out_bf = jax.block_until_ready(out_bf)
    y_ref_n, h_ref_n = gru_reference(
        x_t, jnp.ones((NSTEPS, BATCH, 1), jnp.float32), hidden, params)
    assert jnp.allclose(out_bf, y_ref_n.reshape(NSTEPS * BATCH, HIDDEN_DIM),
                        atol=1e-1, rtol=1e-1)
    assert jnp.allclose(h_bf, h_ref_n, atol=1e-1, rtol=1e-1)

    print("KERNEL_OK")
</pallas_src>

<mosaic_0001>
module attributes {stable_mosaic.version = 11 : i64} {
  func.func @_gru_kernel(%arg0: i32, %arg1: i32, %arg2: memref<8x8x32xf32, #tpu.memory_space<vmem>>, %arg3: memref<8x8x1xf32, #tpu.memory_space<vmem>>, %arg4: memref<8x128xf32, #tpu.memory_space<vmem>>, %arg5: memref<32x384xf32, #tpu.memory_space<vmem>>, %arg6: memref<128x384xf32, #tpu.memory_space<vmem>>, %arg7: memref<1x384xf32, #tpu.memory_space<vmem>>, %arg8: memref<1x128xf32, #tpu.memory_space<vmem>>, %arg9: memref<8x8x128xf32, #tpu.memory_space<vmem>>, %arg10: memref<8x128xf32, #tpu.memory_space<vmem>>) attributes {dimension_semantics = [#tpu.dimension_semantics<parallel>, #tpu.dimension_semantics<arbitrary>], iteration_bounds = array<i64: 1, 1>, scalar_prefetch = 0 : i64, scratch_operands = 0 : i64, tpu.core_type = #tpu.core_type<tc>, window_params = [{transform_indices = @transform_0, window_bounds = array<i64: 8, 8, 32>}, {transform_indices = @transform_1, window_bounds = array<i64: 8, 8, 1>}, {transform_indices = @transform_2, window_bounds = array<i64: 8, 128>}, {pipeline_mode = #tpu.pipeline_mode<synchronous>, transform_indices = @transform_3, window_bounds = array<i64: 32, 384>}, {pipeline_mode = #tpu.pipeline_mode<synchronous>, transform_indices = @transform_4, window_bounds = array<i64: 128, 384>}, {pipeline_mode = #tpu.pipeline_mode<synchronous>, transform_indices = @transform_5, window_bounds = array<i64: 1, 384>}, {pipeline_mode = #tpu.pipeline_mode<synchronous>, transform_indices = @transform_6, window_bounds = array<i64: 1, 128>}, {transform_indices = @transform_7, window_bounds = array<i64: 8, 8, 128>}, {transform_indices = @transform_8, window_bounds = array<i64: 8, 128>}]} {
    %c0_i32 = arith.constant 0 : i32
    %0 = arith.cmpi eq, %arg1, %c0_i32 : i32
    %1 = arith.extui %0 : i1 to i32
    %c0_i32_0 = arith.constant 0 : i32
    %2 = arith.cmpi ne, %1, %c0_i32_0 : i32
    scf.if %2 {
      %c0_100 = arith.constant 0 : index
      %c0_101 = arith.constant 0 : index
      %361 = vector.load %arg4[%c0_100, %c0_101] : memref<8x128xf32, #tpu.memory_space<vmem>>, vector<8x128xf32>
      %c0_102 = arith.constant 0 : index
      %c0_103 = arith.constant 0 : index
      %362 = vector.load %arg10[%c0_102, %c0_103] : memref<8x128xf32, #tpu.memory_space<vmem>>, vector<8x128xf32>
      tpu.vector_store %arg10[%c0_102, %c0_103], %361 {strides = array<i32>} : memref<8x128xf32, #tpu.memory_space<vmem>>, vector<8x128xf32>,
    } else {
    }
    %c0 = arith.constant 0 : index
    %c0_1 = arith.constant 0 : index
    %3 = vector.load %arg5[%c0, %c0_1] : memref<32x384xf32, #tpu.memory_space<vmem>>, vector<32x384xf32>
    %c0_2 = arith.constant 0 : index
    %c0_3 = arith.constant 0 : index
    %4 = vector.load %arg6[%c0_2, %c0_3] : memref<128x384xf32, #tpu.memory_space<vmem>>, vector<128x384xf32>
    %c0_4 = arith.constant 0 : index
    %c0_5 = arith.constant 0 : index
    %5 = vector.load %arg7[%c0_4, %c0_5] : memref<1x384xf32, #tpu.memory_space<vmem>>, vector<1x384xf32>
    %c0_6 = arith.constant 0 : index
    %c0_7 = arith.constant 0 : index
    %6 = vector.load %arg8[%c0_6, %c0_7] : memref<1x128xf32, #tpu.memory_space<vmem>>, vector<1x128xf32>
    %c0_8 = arith.constant 0 : index
    %c0_9 = arith.constant 0 : index
    %7 = vector.load %arg10[%c0_8, %c0_9] : memref<8x128xf32, #tpu.memory_space<vmem>>, vector<8x128xf32>
    %c0_i32_10 = arith.constant 0 : i32
    %8 = arith.index_cast %c0_i32_10 : i32 to index
    %c0_11 = arith.constant 0 : index
    %c0_12 = arith.constant 0 : index
    %9 = vector.load %arg3[%8, %c0_11, %c0_12] : memref<8x8x1xf32, #tpu.memory_space<vmem>>, vector<1x8x1xf32>
    %10 = vector.shape_cast %9 : vector<1x8x1xf32> to vector<8x1xf32>
    %11 = vector.broadcast %10 : vector<8x1xf32> to vector<8x128xf32>
    %12 = arith.mulf %7, %11 : vector<8x128xf32>
    %13 = arith.index_cast %c0_i32_10 : i32 to index
    %c0_13 = arith.constant 0 : index
    %c0_14 = arith.constant 0 : index
    %14 = vector.load %arg2[%13, %c0_13, %c0_14] : memref<8x8x32xf32, #tpu.memory_space<vmem>>, vector<1x8x32xf32>
    %15 = vector.shape_cast %14 : vector<1x8x32xf32> to vector<8x32xf32>
    %cst = arith.constant dense<0.000000e+00> : vector<8x384xf32>
    %16 = tpu.matmul %15, %3, %cst {dimension_numbers = #tpu.dot_dimension_numbers<[1], [0], [0], [1], [0, 0, 1, 1], [], []>} : vector<8x32xf32>, vector<32x384xf32>, vector<8x384xf32> -> vector<8x384xf32>
    %17 = vector.broadcast %5 : vector<1x384xf32> to vector<8x384xf32>
    %18 = arith.addf %16, %17 : vector<8x384xf32>
    %cst_15 = arith.constant dense<0.000000e+00> : vector<8x384xf32>
    %19 = tpu.matmul %12, %4, %cst_15 {dimension_numbers = #tpu.dot_dimension_numbers<[1], [0], [0], [1], [0, 0, 1, 1], [], []>} : vector<8x128xf32>, vector<128x384xf32>, vector<8x384xf32> -> vector<8x384xf32>
    %20 = vector.extract_strided_slice %18 {offsets = [0, 0], sizes = [8, 128], strides = [1, 1]} : vector<8x384xf32> to vector<8x128xf32>
    %21 = vector.extract_strided_slice %19 {offsets = [0, 0], sizes = [8, 128], strides = [1, 1]} : vector<8x384xf32> to vector<8x128xf32>
    %22 = arith.addf %20, %21 : vector<8x128xf32>
    %23 = arith.negf %22 : vector<8x128xf32>
    %24 = math.exp %23 : vector<8x128xf32>
    %cst_16 = arith.constant 1.000000e+00 : f32
    %25 = vector.broadcast %cst_16 : f32 to vector<8x128xf32>
    %26 = arith.addf %25, %24 : vector<8x128xf32>
    %27 = arith.divf %25, %26 : vector<8x128xf32>
    %28 = vector.extract_strided_slice %18 {offsets = [0, 128], sizes = [8, 128], strides = [1, 1]} : vector<8x384xf32> to vector<8x128xf32>
    %29 = vector.extract_strided_slice %19 {offsets = [0, 128], sizes = [8, 128], strides = [1, 1]} : vector<8x384xf32> to vector<8x128xf32>
    %30 = arith.addf %28, %29 : vector<8x128xf32>
    %31 = arith.negf %30 : vector<8x128xf32>
    %32 = math.exp %31 : vector<8x128xf32>
    %cst_17 = arith.constant 1.000000e+00 : f32
    %33 = vector.broadcast %cst_17 : f32 to vector<8x128xf32>
    %34 = arith.addf %33, %32 : vector<8x128xf32>
    %35 = arith.divf %33, %34 : vector<8x128xf32>
    %36 = vector.extract_strided_slice %18 {offsets = [0, 256], sizes = [8, 128], strides = [1, 1]} : vector<8x384xf32> to vector<8x128xf32>
    %37 = vector.extract_strided_slice %19 {offsets = [0, 256], sizes = [8, 128], strides = [1, 1]} : vector<8x384xf32> to vector<8x128xf32>
    %38 = vector.broadcast %6 : vector<1x128xf32> to vector<8x128xf32>
    %39 = arith.addf %37, %38 : vector<8x128xf32>
    %40 = arith.mulf %27, %39 : vector<8x128xf32>
    %41 = arith.addf %36, %40 : vector<8x128xf32>
    %42 = math.tanh %41 : vector<8x128xf32>
    %cst_18 = arith.constant 1.000000e+00 : f32
    %43 = vector.broadcast %cst_18 : f32 to vector<8x128xf32>
    %44 = arith.subf %43, %35 : vector<8x128xf32>
    %45 = arith.mulf %44, %42 : vector<8x128xf32>
    %46 = arith.mulf %35, %12 : vector<8x128xf32>
    %47 = arith.addf %45, %46 : vector<8x128xf32>
    %48 = arith.index_cast %c0_i32_10 : i32 to index
    %c0_19 = arith.constant 0 : index
    %c0_20 = arith.constant 0 : index
    %49 = vector.load %arg9[%48, %c0_19, %c0_20] : memref<8x8x128xf32, #tpu.memory_space<vmem>>, vector<1x8x128xf32>
    %50 = vector.shape_cast %49 : vector<1x8x128xf32> to vector<8x128xf32>
    %51 = vector.shape_cast %47 : vector<8x128xf32> to vector<1x8x128xf32>
    tpu.vector_store %arg9[%48, %c0_19, %c0_20], %51 {strides = array<i32>} : memref<8x8x128xf32, #tpu.memory_space<vmem>>, vector<1x8x128xf32>,
    %c1_i32 = arith.constant 1 : i32
    %52 = arith.index_cast %c1_i32 : i32 to index
    %c0_21 = arith.constant 0 : index
    %c0_22 = arith.constant 0 : index
    %53 = vector.load %arg3[%52, %c0_21, %c0_22] : memref<8x8x1xf32, #tpu.memory_space<vmem>>, vector<1x8x1xf32>
    %54 = vector.shape_cast %53 : vector<1x8x1xf32> to vector<8x1xf32>
    %55 = vector.broadcast %54 : vector<8x1xf32> to vector<8x128xf32>
    %56 = arith.mulf %47, %55 : vector<8x128xf32>
    %57 = arith.index_cast %c1_i32 : i32 to index
    %c0_23 = arith.constant 0 : index
    %c0_24 = arith.constant 0 : index
    %58 = vector.load %arg2[%57, %c0_23, %c0_24] : memref<8x8x32xf32, #tpu.memory_space<vmem>>, vector<1x8x32xf32>
    %59 = vector.shape_cast %58 : vector<1x8x32xf32> to vector<8x32xf32>
    %cst_25 = arith.constant dense<0.000000e+00> : vector<8x384xf32>
    %60 = tpu.matmul %59, %3, %cst_25 {dimension_numbers = #tpu.dot_dimension_numbers<[1], [0], [0], [1], [0, 0, 1, 1], [], []>} : vector<8x32xf32>, vector<32x384xf32>, vector<8x384xf32> -> vector<8x384xf32>
    %61 = vector.broadcast %5 : vector<1x384xf32> to vector<8x384xf32>
    %62 = arith.addf %60, %61 : vector<8x384xf32>
    %cst_26 = arith.constant dense<0.000000e+00> : vector<8x384xf32>
    %63 = tpu.matmul %56, %4, %cst_26 {dimension_numbers = #tpu.dot_dimension_numbers<[1], [0], [0], [1], [0, 0, 1, 1], [], []>} : vector<8x128xf32>, vector<128x384xf32>, vector<8x384xf32> -> vector<8x384xf32>
    %64 = vector.extract_strided_slice %62 {offsets = [0, 0], sizes = [8, 128], strides = [1, 1]} : vector<8x384xf32> to vector<8x128xf32>
    %65 = vector.extract_strided_slice %63 {offsets = [0, 0], sizes = [8, 128], strides = [1, 1]} : vector<8x384xf32> to vector<8x128xf32>
    %66 = arith.addf %64, %65 : vector<8x128xf32>
    %67 = arith.negf %66 : vector<8x128xf32>
    %68 = math.exp %67 : vector<8x128xf32>
    %cst_27 = arith.constant 1.000000e+00 : f32
    %69 = vector.broadcast %cst_27 : f32 to vector<8x128xf32>
    %70 = arith.addf %69, %68 : vector<8x128xf32>
    %71 = arith.divf %69, %70 : vector<8x128xf32>
    %72 = vector.extract_strided_slice %62 {offsets = [0, 128], sizes = [8, 128], strides = [1, 1]} : vector<8x384xf32> to vector<8x128xf32>
    %73 = vector.extract_strided_slice %63 {offsets = [0, 128], sizes = [8, 128], strides = [1, 1]} : vector<8x384xf32> to vector<8x128xf32>
    %74 = arith.addf %72, %73 : vector<8x128xf32>
    %75 = arith.negf %74 : vector<8x128xf32>
    %76 = math.exp %75 : vector<8x128xf32>
    %cst_28 = arith.constant 1.000000e+00 : f32
    %77 = vector.broadcast %cst_28 : f32 to vector<8x128xf32>
    %78 = arith.addf %77, %76 : vector<8x128xf32>
    %79 = arith.divf %77, %78 : vector<8x128xf32>
    %80 = vector.extract_strided_slice %62 {offsets = [0, 256], sizes = [8, 128], strides = [1, 1]} : vector<8x384xf32> to vector<8x128xf32>
    %81 = vector.extract_strided_slice %63 {offsets = [0, 256], sizes = [8, 128], strides = [1, 1]} : vector<8x384xf32> to vector<8x128xf32>
    %82 = vector.broadcast %6 : vector<1x128xf32> to vector<8x128xf32>
    %83 = arith.addf %81, %82 : vector<8x128xf32>
    %84 = arith.mulf %71, %83 : vector<8x128xf32>
    %85 = arith.addf %80, %84 : vector<8x128xf32>
    %86 = math.tanh %85 : vector<8x128xf32>
    %cst_29 = arith.constant 1.000000e+00 : f32
    %87 = vector.broadcast %cst_29 : f32 to vector<8x128xf32>
    %88 = arith.subf %87, %79 : vector<8x128xf32>
    %89 = arith.mulf %88, %86 : vector<8x128xf32>
    %90 = arith.mulf %79, %56 : vector<8x128xf32>
    %91 = arith.addf %89, %90 : vector<8x128xf32>
    %92 = arith.index_cast %c1_i32 : i32 to index
    %c0_30 = arith.constant 0 : index
    %c0_31 = arith.constant 0 : index
    %93 = vector.load %arg9[%92, %c0_30, %c0_31] : memref<8x8x128xf32, #tpu.memory_space<vmem>>, vector<1x8x128xf32>
    %94 = vector.shape_cast %93 : vector<1x8x128xf32> to vector<8x128xf32>
    %95 = vector.shape_cast %91 : vector<8x128xf32> to vector<1x8x128xf32>
    tpu.vector_store %arg9[%92, %c0_30, %c0_31], %95 {strides = array<i32>} : memref<8x8x128xf32, #tpu.memory_space<vmem>>, vector<1x8x128xf32>,
    %c2_i32 = arith.constant 2 : i32
    %96 = arith.index_cast %c2_i32 : i32 to index
    %c0_32 = arith.constant 0 : index
    %c0_33 = arith.constant 0 : index
    %97 = vector.load %arg3[%96, %c0_32, %c0_33] : memref<8x8x1xf32, #tpu.memory_space<vmem>>, vector<1x8x1xf32>
    %98 = vector.shape_cast %97 : vector<1x8x1xf32> to vector<8x1xf32>
    %99 = vector.broadcast %98 : vector<8x1xf32> to vector<8x128xf32>
    %100 = arith.mulf %91, %99 : vector<8x128xf32>
    %101 = arith.index_cast %c2_i32 : i32 to index
    %c0_34 = arith.constant 0 : index
    %c0_35 = arith.constant 0 : index
    %102 = vector.load %arg2[%101, %c0_34, %c0_35] : memref<8x8x32xf32, #tpu.memory_space<vmem>>, vector<1x8x32xf32>
    %103 = vector.shape_cast %102 : vector<1x8x32xf32> to vector<8x32xf32>
    %cst_36 = arith.constant dense<0.000000e+00> : vector<8x384xf32>
    %104 = tpu.matmul %103, %3, %cst_36 {dimension_numbers = #tpu.dot_dimension_numbers<[1], [0], [0], [1], [0, 0, 1, 1], [], []>} : vector<8x32xf32>, vector<32x384xf32>, vector<8x384xf32> -> vector<8x384xf32>
    %105 = vector.broadcast %5 : vector<1x384xf32> to vector<8x384xf32>
    %106 = arith.addf %104, %105 : vector<8x384xf32>
    %cst_37 = arith.constant dense<0.000000e+00> : vector<8x384xf32>
    %107 = tpu.matmul %100, %4, %cst_37 {dimension_numbers = #tpu.dot_dimension_numbers<[1], [0], [0], [1], [0, 0, 1, 1], [], []>} : vector<8x128xf32>, vector<128x384xf32>, vector<8x384xf32> -> vector<8x384xf32>
    %108 = vector.extract_strided_slice %106 {offsets = [0, 0], sizes = [8, 128], strides = [1, 1]} : vector<8x384xf32> to vector<8x128xf32>
    %109 = vector.extract_strided_slice %107 {offsets = [0, 0], sizes = [8, 128], strides = [1, 1]} : vector<8x384xf32> to vector<8x128xf32>
    %110 = arith.addf %108, %109 : vector<8x128xf32>
    %111 = arith.negf %110 : vector<8x128xf32>
    %112 = math.exp %111 : vector<8x128xf32>
    %cst_38 = arith.constant 1.000000e+00 : f32
    %113 = vector.broadcast %cst_38 : f32 to vector<8x128xf32>
    %114 = arith.addf %113, %112 : vector<8x128xf32>
    %115 = arith.divf %113, %114 : vector<8x128xf32>
    %116 = vector.extract_strided_slice %106 {offsets = [0, 128], sizes = [8, 128], strides = [1, 1]} : vector<8x384xf32> to vector<8x128xf32>
    %117 = vector.extract_strided_slice %107 {offsets = [0, 128], sizes = [8, 128], strides = [1, 1]} : vector<8x384xf32> to vector<8x128xf32>
    %118 = arith.addf %116, %117 : vector<8x128xf32>
    %119 = arith.negf %118 : vector<8x128xf32>
    %120 = math.exp %119 : vector<8x128xf32>
    %cst_39 = arith.constant 1.000000e+00 : f32
    %121 = vector.broadcast %cst_39 : f32 to vector<8x128xf32>
    %122 = arith.addf %121, %120 : vector<8x128xf32>
    %123 = arith.divf %121, %122 : vector<8x128xf32>
    %124 = vector.extract_strided_slice %106 {offsets = [0, 256], sizes = [8, 128], strides = [1, 1]} : vector<8x384xf32> to vector<8x128xf32>
    %125 = vector.extract_strided_slice %107 {offsets = [0, 256], sizes = [8, 128], strides = [1, 1]} : vector<8x384xf32> to vector<8x128xf32>
    %126 = vector.broadcast %6 : vector<1x128xf32> to vector<8x128xf32>
    %127 = arith.addf %125, %126 : vector<8x128xf32>
    %128 = arith.mulf %115, %127 : vector<8x128xf32>
    %129 = arith.addf %124, %128 : vector<8x128xf32>
    %130 = math.tanh %129 : vector<8x128xf32>
    %cst_40 = arith.constant 1.000000e+00 : f32
    %131 = vector.broadcast %cst_40 : f32 to vector<8x128xf32>
    %132 = arith.subf %131, %123 : vector<8x128xf32>
    %133 = arith.mulf %132, %130 : vector<8x128xf32>
    %134 = arith.mulf %123, %100 : vector<8x128xf32>
    %135 = arith.addf %133, %134 : vector<8x128xf32>
    %136 = arith.index_cast %c2_i32 : i32 to index
    %c0_41 = arith.constant 0 : index
    %c0_42 = arith.constant 0 : index
    %137 = vector.load %arg9[%136, %c0_41, %c0_42] : memref<8x8x128xf32, #tpu.memory_space<vmem>>, vector<1x8x128xf32>
    %138 = vector.shape_cast %137 : vector<1x8x128xf32> to vector<8x128xf32>
    %139 = vector.shape_cast %135 : vector<8x128xf32> to vector<1x8x128xf32>
    tpu.vector_store %arg9[%136, %c0_41, %c0_42], %139 {strides = array<i32>} : memref<8x8x128xf32, #tpu.memory_space<vmem>>, vector<1x8x128xf32>,
    %c3_i32 = arith.constant 3 : i32
    %140 = arith.index_cast %c3_i32 : i32 to index
    %c0_43 = arith.constant 0 : index
    %c0_44 = arith.constant 0 : index
    %141 = vector.load %arg3[%140, %c0_43, %c0_44] : memref<8x8x1xf32, #tpu.memory_space<vmem>>, vector<1x8x1xf32>
    %142 = vector.shape_cast %141 : vector<1x8x1xf32> to vector<8x1xf32>
    %143 = vector.broadcast %142 : vector<8x1xf32> to vector<8x128xf32>
    %144 = arith.mulf %135, %143 : vector<8x128xf32>
    %145 = arith.index_cast %c3_i32 : i32 to index
    %c0_45 = arith.constant 0 : index
    %c0_46 = arith.constant 0 : index
    %146 = vector.load %arg2[%145, %c0_45, %c0_46] : memref<8x8x32xf32, #tpu.memory_space<vmem>>, vector<1x8x32xf32>
    %147 = vector.shape_cast %146 : vector<1x8x32xf32> to vector<8x32xf32>
    %cst_47 = arith.constant dense<0.000000e+00> : vector<8x384xf32>
    %148 = tpu.matmul %147, %3, %cst_47 {dimension_numbers = #tpu.dot_dimension_numbers<[1], [0], [0], [1], [0, 0, 1, 1], [], []>} : vector<8x32xf32>, vector<32x384xf32>, vector<8x384xf32> -> vector<8x384xf32>
    %149 = vector.broadcast %5 : vector<1x384xf32> to vector<8x384xf32>
    %150 = arith.addf %148, %149 : vector<8x384xf32>
    %cst_48 = arith.constant dense<0.000000e+00> : vector<8x384xf32>
    %151 = tpu.matmul %144, %4, %cst_48 {dimension_numbers = #tpu.dot_dimension_numbers<[1], [0], [0], [1], [0, 0, 1, 1], [], []>} : vector<8x128xf32>, vector<128x384xf32>, vector<8x384xf32> -> vector<8x384xf32>
    %152 = vector.extract_strided_slice %150 {offsets = [0, 0], sizes = [8, 128], strides = [1, 1]} : vector<8x384xf32> to vector<8x128xf32>
    %153 = vector.extract_strided_slice %151 {offsets = [0, 0], sizes = [8, 128], strides = [1, 1]} : vector<8x384xf32> to vector<8x128xf32>
    %154 = arith.addf %152, %153 : vector<8x128xf32>
    %155 = arith.negf %154 : vector<8x128xf32>
    %156 = math.exp %155 : vector<8x128xf32>
    %cst_49 = arith.constant 1.000000e+00 : f32
    %157 = vector.broadcast %cst_49 : f32 to vector<8x128xf32>
    %158 = arith.addf %157, %156 : vector<8x128xf32>
    %159 = arith.divf %157, %158 : vector<8x128xf32>
    %160 = vector.extract_strided_slice %150 {offsets = [0, 128], sizes = [8, 128], strides = [1, 1]} : vector<8x384xf32> to vector<8x128xf32>
    %161 = vector.extract_strided_slice %151 {offsets = [0, 128], sizes = [8, 128], strides = [1, 1]} : vector<8x384xf32> to vector<8x128xf32>
    %162 = arith.addf %160, %161 : vector<8x128xf32>
    %163 = arith.negf %162 : vector<8x128xf32>
    %164 = math.exp %163 : vector<8x128xf32>
    %cst_50 = arith.constant 1.000000e+00 : f32
    %165 = vector.broadcast %cst_50 : f32 to vector<8x128xf32>
    %166 = arith.addf %165, %164 : vector<8x128xf32>
    %167 = arith.divf %165, %166 : vector<8x128xf32>
    %168 = vector.extract_strided_slice %150 {offsets = [0, 256], sizes = [8, 128], strides = [1, 1]} : vector<8x384xf32> to vector<8x128xf32>
    %169 = vector.extract_strided_slice %151 {offsets = [0, 256], sizes = [8, 128], strides = [1, 1]} : vector<8x384xf32> to vector<8x128xf32>
    %170 = vector.broadcast %6 : vector<1x128xf32> to vector<8x128xf32>
    %171 = arith.addf %169, %170 : vector<8x128xf32>
    %172 = arith.mulf %159, %171 : vector<8x128xf32>
    %173 = arith.addf %168, %172 : vector<8x128xf32>
    %174 = math.tanh %173 : vector<8x128xf32>
    %cst_51 = arith.constant 1.000000e+00 : f32
    %175 = vector.broadcast %cst_51 : f32 to vector<8x128xf32>
    %176 = arith.subf %175, %167 : vector<8x128xf32>
    %177 = arith.mulf %176, %174 : vector<8x128xf32>
    %178 = arith.mulf %167, %144 : vector<8x128xf32>
    %179 = arith.addf %177, %178 : vector<8x128xf32>
    %180 = arith.index_cast %c3_i32 : i32 to index
    %c0_52 = arith.constant 0 : index
    %c0_53 = arith.constant 0 : index
    %181 = vector.load %arg9[%180, %c0_52, %c0_53] : memref<8x8x128xf32, #tpu.memory_space<vmem>>, vector<1x8x128xf32>
    %182 = vector.shape_cast %181 : vector<1x8x128xf32> to vector<8x128xf32>
    %183 = vector.shape_cast %179 : vector<8x128xf32> to vector<1x8x128xf32>
    tpu.vector_store %arg9[%180, %c0_52, %c0_53], %183 {strides = array<i32>} : memref<8x8x128xf32, #tpu.memory_space<vmem>>, vector<1x8x128xf32>,
    %c4_i32 = arith.constant 4 : i32
    %184 = arith.index_cast %c4_i32 : i32 to index
    %c0_54 = arith.constant 0 : index
    %c0_55 = arith.constant 0 : index
    %185 = vector.load %arg3[%184, %c0_54, %c0_55] : memref<8x8x1xf32, #tpu.memory_space<vmem>>, vector<1x8x1xf32>
    %186 = vector.shape_cast %185 : vector<1x8x1xf32> to vector<8x1xf32>
    %187 = vector.broadcast %186 : vector<8x1xf32> to vector<8x128xf32>
    %188 = arith.mulf %179, %187 : vector<8x128xf32>
    %189 = arith.index_cast %c4_i32 : i32 to index
    %c0_56 = arith.constant 0 : index
    %c0_57 = arith.constant 0 : index
    %190 = vector.load %arg2[%189, %c0_56, %c0_57] : memref<8x8x32xf32, #tpu.memory_space<vmem>>, vector<1x8x32xf32>
    %191 = vector.shape_cast %190 : vector<1x8x32xf32> to vector<8x32xf32>
    %cst_58 = arith.constant dense<0.000000e+00> : vector<8x384xf32>
    %192 = tpu.matmul %191, %3, %cst_58 {dimension_numbers = #tpu.dot_dimension_numbers<[1], [0], [0], [1], [0, 0, 1, 1], [], []>} : vector<8x32xf32>, vector<32x384xf32>, vector<8x384xf32> -> vector<8x384xf32>
    %193 = vector.broadcast %5 : vector<1x384xf32> to vector<8x384xf32>
    %194 = arith.addf %192, %193 : vector<8x384xf32>
    %cst_59 = arith.constant dense<0.000000e+00> : vector<8x384xf32>
    %195 = tpu.matmul %188, %4, %cst_59 {dimension_numbers = #tpu.dot_dimension_numbers<[1], [0], [0], [1], [0, 0, 1, 1], [], []>} : vector<8x128xf32>, vector<128x384xf32>, vector<8x384xf32> -> vector<8x384xf32>
    %196 = vector.extract_strided_slice %194 {offsets = [0, 0], sizes = [8, 128], strides = [1, 1]} : vector<8x384xf32> to vector<8x128xf32>
    %197 = vector.extract_strided_slice %195 {offsets = [0, 0], sizes = [8, 128], strides = [1, 1]} : vector<8x384xf32> to vector<8x128xf32>
    %198 = arith.addf %196, %197 : vector<8x128xf32>
    %199 = arith.negf %198 : vector<8x128xf32>
    %200 = math.exp %199 : vector<8x128xf32>
    %cst_60 = arith.constant 1.000000e+00 : f32
    %201 = vector.broadcast %cst_60 : f32 to vector<8x128xf32>
    %202 = arith.addf %201, %200 : vector<8x128xf32>
    %203 = arith.divf %201, %202 : vector<8x128xf32>
    %204 = vector.extract_strided_slice %194 {offsets = [0, 128], sizes = [8, 128], strides = [1, 1]} : vector<8x384xf32> to vector<8x128xf32>
    %205 = vector.extract_strided_slice %195 {offsets = [0, 128], sizes = [8, 128], strides = [1, 1]} : vector<8x384xf32> to vector<8x128xf32>
    %206 = arith.addf %204, %205 : vector<8x128xf32>
    %207 = arith.negf %206 : vector<8x128xf32>
    %208 = math.exp %207 : vector<8x128xf32>
    %cst_61 = arith.constant 1.000000e+00 : f32
    %209 = vector.broadcast %cst_61 : f32 to vector<8x128xf32>
    %210 = arith.addf %209, %208 : vector<8x128xf32>
    %211 = arith.divf %209, %210 : vector<8x128xf32>
    %212 = vector.extract_strided_slice %194 {offsets = [0, 256], sizes = [8, 128], strides = [1, 1]} : vector<8x384xf32> to vector<8x128xf32>
    %213 = vector.extract_strided_slice %195 {offsets = [0, 256], sizes = [8, 128], strides = [1, 1]} : vector<8x384xf32> to vector<8x128xf32>
    %214 = vector.broadcast %6 : vector<1x128xf32> to vector<8x128xf32>
    %215 = arith.addf %213, %214 : vector<8x128xf32>
    %216 = arith.mulf %203, %215 : vector<8x128xf32>
    %217 = arith.addf %212, %216 : vector<8x128xf32>
    %218 = math.tanh %217 : vector<8x128xf32>
    %cst_62 = arith.constant 1.000000e+00 : f32
    %219 = vector.broadcast %cst_62 : f32 to vector<8x128xf32>
    %220 = arith.subf %219, %211 : vector<8x128xf32>
    %221 = arith.mulf %220, %218 : vector<8x128xf32>
    %222 = arith.mulf %211, %188 : vector<8x128xf32>
    %223 = arith.addf %221, %222 : vector<8x128xf32>
    %224 = arith.index_cast %c4_i32 : i32 to index
    %c0_63 = arith.constant 0 : index
    %c0_64 = arith.constant 0 : index
    %225 = vector.load %arg9[%224, %c0_63, %c0_64] : memref<8x8x128xf32, #tpu.memory_space<vmem>>, vector<1x8x128xf32>
    %226 = vector.shape_cast %225 : vector<1x8x128xf32> to vector<8x128xf32>
    %227 = vector.shape_cast %223 : vector<8x128xf32> to vector<1x8x128xf32>
    tpu.vector_store %arg9[%224, %c0_63, %c0_64], %227 {strides = array<i32>} : memref<8x8x128xf32, #tpu.memory_space<vmem>>, vector<1x8x128xf32>,
    %c5_i32 = arith.constant 5 : i32
    %228 = arith.index_cast %c5_i32 : i32 to index
    %c0_65 = arith.constant 0 : index
    %c0_66 = arith.constant 0 : index
    %229 = vector.load %arg3[%228, %c0_65, %c0_66] : memref<8x8x1xf32, #tpu.memory_space<vmem>>, vector<1x8x1xf32>
    %230 = vector.shape_cast %229 : vector<1x8x1xf32> to vector<8x1xf32>
    %231 = vector.broadcast %230 : vector<8x1xf32> to vector<8x128xf32>
    %232 = arith.mulf %223, %231 : vector<8x128xf32>
    %233 = arith.index_cast %c5_i32 : i32 to index
    %c0_67 = arith.constant 0 : index
    %c0_68 = arith.constant 0 : index
    %234 = vector.load %arg2[%233, %c0_67, %c0_68] : memref<8x8x32xf32, #tpu.memory_space<vmem>>, vector<1x8x32xf32>
    %235 = vector.shape_cast %234 : vector<1x8x32xf32> to vector<8x32xf32>
    %cst_69 = arith.constant dense<0.000000e+00> : vector<8x384xf32>
    %236 = tpu.matmul %235, %3, %cst_69 {dimension_numbers = #tpu.dot_dimension_numbers<[1], [0], [0], [1], [0, 0, 1, 1], [], []>} : vector<8x32xf32>, vector<32x384xf32>, vector<8x384xf32> -> vector<8x384xf32>
    %237 = vector.broadcast %5 : vector<1x384xf32> to vector<8x384xf32>
    %238 = arith.addf %236, %237 : vector<8x384xf32>
    %cst_70 = arith.constant dense<0.000000e+00> : vector<8x384xf32>
    %239 = tpu.matmul %232, %4, %cst_70 {dimension_numbers = #tpu.dot_dimension_numbers<[1], [0], [0], [1], [0, 0, 1, 1], [], []>} : vector<8x128xf32>, vector<128x384xf32>, vector<8x384xf32> -> vector<8x384xf32>
    %240 = vector.extract_strided_slice %238 {offsets = [0, 0], sizes = [8, 128], strides = [1, 1]} : vector<8x384xf32> to vector<8x128xf32>
    %241 = vector.extract_strided_slice %239 {offsets = [0, 0], sizes = [8, 128], strides = [1, 1]} : vector<8x384xf32> to vector<8x128xf32>
    %242 = arith.addf %240, %241 : vector<8x128xf32>
    %243 = arith.negf %242 : vector<8x128xf32>
    %244 = math.exp %243 : vector<8x128xf32>
    %cst_71 = arith.constant 1.000000e+00 : f32
    %245 = vector.broadcast %cst_71 : f32 to vector<8x128xf32>
    %246 = arith.addf %245, %244 : vector<8x128xf32>
    %247 = arith.divf %245, %246 : vector<8x128xf32>
    %248 = vector.extract_strided_slice %238 {offsets = [0, 128], sizes = [8, 128], strides = [1, 1]} : vector<8x384xf32> to vector<8x128xf32>
    %249 = vector.extract_strided_slice %239 {offsets = [0, 128], sizes = [8, 128], strides = [1, 1]} : vector<8x384xf32> to vector<8x128xf32>
    %250 = arith.addf %248, %249 : vector<8x128xf32>
    %251 = arith.negf %250 : vector<8x128xf32>
    %252 = math.exp %251 : vector<8x128xf32>
    %cst_72 = arith.constant 1.000000e+00 : f32
    %253 = vector.broadcast %cst_72 : f32 to vector<8x128xf32>
    %254 = arith.addf %253, %252 : vector<8x128xf32>
    %255 = arith.divf %253, %254 : vector<8x128xf32>
    %256 = vector.extract_strided_slice %238 {offsets = [0, 256], sizes = [8, 128], strides = [1, 1]} : vector<8x384xf32> to vector<8x128xf32>
    %257 = vector.extract_strided_slice %239 {offsets = [0, 256], sizes = [8, 128], strides = [1, 1]} : vector<8x384xf32> to vector<8x128xf32>
    %258 = vector.broadcast %6 : vector<1x128xf32> to vector<8x128xf32>
    %259 = arith.addf %257, %258 : vector<8x128xf32>
    %260 = arith.mulf %247, %259 : vector<8x128xf32>
    %261 = arith.addf %256, %260 : vector<8x128xf32>
    %262 = math.tanh %261 : vector<8x128xf32>
    %cst_73 = arith.constant 1.000000e+00 : f32
    %263 = vector.broadcast %cst_73 : f32 to vector<8x128xf32>
    %264 = arith.subf %263, %255 : vector<8x128xf32>
    %265 = arith.mulf %264, %262 : vector<8x128xf32>
    %266 = arith.mulf %255, %232 : vector<8x128xf32>
    %267 = arith.addf %265, %266 : vector<8x128xf32>
    %268 = arith.index_cast %c5_i32 : i32 to index
    %c0_74 = arith.constant 0 : index
    %c0_75 = arith.constant 0 : index
    %269 = vector.load %arg9[%268, %c0_74, %c0_75] : memref<8x8x128xf32, #tpu.memory_space<vmem>>, vector<1x8x128xf32>
    %270 = vector.shape_cast %269 : vector<1x8x128xf32> to vector<8x128xf32>
    %271 = vector.shape_cast %267 : vector<8x128xf32> to vector<1x8x128xf32>
    tpu.vector_store %arg9[%268, %c0_74, %c0_75], %271 {strides = array<i32>} : memref<8x8x128xf32, #tpu.memory_space<vmem>>, vector<1x8x128xf32>,
    %c6_i32 = arith.constant 6 : i32
    %272 = arith.index_cast %c6_i32 : i32 to index
    %c0_76 = arith.constant 0 : index
    %c0_77 = arith.constant 0 : index
    %273 = vector.load %arg3[%272, %c0_76, %c0_77] : memref<8x8x1xf32, #tpu.memory_space<vmem>>, vector<1x8x1xf32>
    %274 = vector.shape_cast %273 : vector<1x8x1xf32> to vector<8x1xf32>
    %275 = vector.broadcast %274 : vector<8x1xf32> to vector<8x128xf32>
    %276 = arith.mulf %267, %275 : vector<8x128xf32>
    %277 = arith.index_cast %c6_i32 : i32 to index
    %c0_78 = arith.constant 0 : index
    %c0_79 = arith.constant 0 : index
    %278 = vector.load %arg2[%277, %c0_78, %c0_79] : memref<8x8x32xf32, #tpu.memory_space<vmem>>, vector<1x8x32xf32>
    %279 = vector.shape_cast %278 : vector<1x8x32xf32> to vector<8x32xf32>
    %cst_80 = arith.constant dense<0.000000e+00> : vector<8x384xf32>
    %280 = tpu.matmul %279, %3, %cst_80 {dimension_numbers = #tpu.dot_dimension_numbers<[1], [0], [0], [1], [0, 0, 1, 1], [], []>} : vector<8x32xf32>, vector<32x384xf32>, vector<8x384xf32> -> vector<8x384xf32>
    %281 = vector.broadcast %5 : vector<1x384xf32> to vector<8x384xf32>
    %282 = arith.addf %280, %281 : vector<8x384xf32>
    %cst_81 = arith.constant dense<0.000000e+00> : vector<8x384xf32>
    %283 = tpu.matmul %276, %4, %cst_81 {dimension_numbers = #tpu.dot_dimension_numbers<[1], [0], [0], [1], [0, 0, 1, 1], [], []>} : vector<8x128xf32>, vector<128x384xf32>, vector<8x384xf32> -> vector<8x384xf32>
    %284 = vector.extract_strided_slice %282 {offsets = [0, 0], sizes = [8, 128], strides = [1, 1]} : vector<8x384xf32> to vector<8x128xf32>
    %285 = vector.extract_strided_slice %283 {offsets = [0, 0], sizes = [8, 128], strides = [1, 1]} : vector<8x384xf32> to vector<8x128xf32>
    %286 = arith.addf %284, %285 : vector<8x128xf32>
    %287 = arith.negf %286 : vector<8x128xf32>
    %288 = math.exp %287 : vector<8x128xf32>
    %cst_82 = arith.constant 1.000000e+00 : f32
    %289 = vector.broadcast %cst_82 : f32 to vector<8x128xf32>
    %290 = arith.addf %289, %288 : vector<8x128xf32>
    %291 = arith.divf %289, %290 : vector<8x128xf32>
    %292 = vector.extract_strided_slice %282 {offsets = [0, 128], sizes = [8, 128], strides = [1, 1]} : vector<8x384xf32> to vector<8x128xf32>
    %293 = vector.extract_strided_slice %283 {offsets = [0, 128], sizes = [8, 128], strides = [1, 1]} : vector<8x384xf32> to vector<8x128xf32>
    %294 = arith.addf %292, %293 : vector<8x128xf32>
    %295 = arith.negf %294 : vector<8x128xf32>
    %296 = math.exp %295 : vector<8x128xf32>
    %cst_83 = arith.constant 1.000000e+00 : f32
    %297 = vector.broadcast %cst_83 : f32 to vector<8x128xf32>
    %298 = arith.addf %297, %296 : vector<8x128xf32>
    %299 = arith.divf %297, %298 : vector<8x128xf32>
    %300 = vector.extract_strided_slice %282 {offsets = [0, 256], sizes = [8, 128], strides = [1, 1]} : vector<8x384xf32> to vector<8x128xf32>
    %301 = vector.extract_strided_slice %283 {offsets = [0, 256], sizes = [8, 128], strides = [1, 1]} : vector<8x384xf32> to vector<8x128xf32>
    %302 = vector.broadcast %6 : vector<1x128xf32> to vector<8x128xf32>
    %303 = arith.addf %301, %302 : vector<8x128xf32>
    %304 = arith.mulf %291, %303 : vector<8x128xf32>
    %305 = arith.addf %300, %304 : vector<8x128xf32>
    %306 = math.tanh %305 : vector<8x128xf32>
    %cst_84 = arith.constant 1.000000e+00 : f32
    %307 = vector.broadcast %cst_84 : f32 to vector<8x128xf32>
    %308 = arith.subf %307, %299 : vector<8x128xf32>
    %309 = arith.mulf %308, %306 : vector<8x128xf32>
    %310 = arith.mulf %299, %276 : vector<8x128xf32>
    %311 = arith.addf %309, %310 : vector<8x128xf32>
    %312 = arith.index_cast %c6_i32 : i32 to index
    %c0_85 = arith.constant 0 : index
    %c0_86 = arith.constant 0 : index
    %313 = vector.load %arg9[%312, %c0_85, %c0_86] : memref<8x8x128xf32, #tpu.memory_space<vmem>>, vector<1x8x128xf32>
    %314 = vector.shape_cast %313 : vector<1x8x128xf32> to vector<8x128xf32>
    %315 = vector.shape_cast %311 : vector<8x128xf32> to vector<1x8x128xf32>
    tpu.vector_store %arg9[%312, %c0_85, %c0_86], %315 {strides = array<i32>} : memref<8x8x128xf32, #tpu.memory_space<vmem>>, vector<1x8x128xf32>,
    %c7_i32 = arith.constant 7 : i32
    %316 = arith.index_cast %c7_i32 : i32 to index
    %c0_87 = arith.constant 0 : index
    %c0_88 = arith.constant 0 : index
    %317 = vector.load %arg3[%316, %c0_87, %c0_88] : memref<8x8x1xf32, #tpu.memory_space<vmem>>, vector<1x8x1xf32>
    %318 = vector.shape_cast %317 : vector<1x8x1xf32> to vector<8x1xf32>
    %319 = vector.broadcast %318 : vector<8x1xf32> to vector<8x128xf32>
    %320 = arith.mulf %311, %319 : vector<8x128xf32>
    %321 = arith.index_cast %c7_i32 : i32 to index
    %c0_89 = arith.constant 0 : index
    %c0_90 = arith.constant 0 : index
    %322 = vector.load %arg2[%321, %c0_89, %c0_90] : memref<8x8x32xf32, #tpu.memory_space<vmem>>, vector<1x8x32xf32>
    %323 = vector.shape_cast %322 : vector<1x8x32xf32> to vector<8x32xf32>
    %cst_91 = arith.constant dense<0.000000e+00> : vector<8x384xf32>
    %324 = tpu.matmul %323, %3, %cst_91 {dimension_numbers = #tpu.dot_dimension_numbers<[1], [0], [0], [1], [0, 0, 1, 1], [], []>} : vector<8x32xf32>, vector<32x384xf32>, vector<8x384xf32> -> vector<8x384xf32>
    %325 = vector.broadcast %5 : vector<1x384xf32> to vector<8x384xf32>
    %326 = arith.addf %324, %325 : vector<8x384xf32>
    %cst_92 = arith.constant dense<0.000000e+00> : vector<8x384xf32>
    %327 = tpu.matmul %320, %4, %cst_92 {dimension_numbers = #tpu.dot_dimension_numbers<[1], [0], [0], [1], [0, 0, 1, 1], [], []>} : vector<8x128xf32>, vector<128x384xf32>, vector<8x384xf32> -> vector<8x384xf32>
    %328 = vector.extract_strided_slice %326 {offsets = [0, 0], sizes = [8, 128], strides = [1, 1]} : vector<8x384xf32> to vector<8x128xf32>
    %329 = vector.extract_strided_slice %327 {offsets = [0, 0], sizes = [8, 128], strides = [1, 1]} : vector<8x384xf32> to vector<8x128xf32>
    %330 = arith.addf %328, %329 : vector<8x128xf32>
    %331 = arith.negf %330 : vector<8x128xf32>
    %332 = math.exp %331 : vector<8x128xf32>
    %cst_93 = arith.constant 1.000000e+00 : f32
    %333 = vector.broadcast %cst_93 : f32 to vector<8x128xf32>
    %334 = arith.addf %333, %332 : vector<8x128xf32>
    %335 = arith.divf %333, %334 : vector<8x128xf32>
    %336 = vector.extract_strided_slice %326 {offsets = [0, 128], sizes = [8, 128], strides = [1, 1]} : vector<8x384xf32> to vector<8x128xf32>
    %337 = vector.extract_strided_slice %327 {offsets = [0, 128], sizes = [8, 128], strides = [1, 1]} : vector<8x384xf32> to vector<8x128xf32>
    %338 = arith.addf %336, %337 : vector<8x128xf32>
    %339 = arith.negf %338 : vector<8x128xf32>
    %340 = math.exp %339 : vector<8x128xf32>
    %cst_94 = arith.constant 1.000000e+00 : f32
    %341 = vector.broadcast %cst_94 : f32 to vector<8x128xf32>
    %342 = arith.addf %341, %340 : vector<8x128xf32>
    %343 = arith.divf %341, %342 : vector<8x128xf32>
    %344 = vector.extract_strided_slice %326 {offsets = [0, 256], sizes = [8, 128], strides = [1, 1]} : vector<8x384xf32> to vector<8x128xf32>
    %345 = vector.extract_strided_slice %327 {offsets = [0, 256], sizes = [8, 128], strides = [1, 1]} : vector<8x384xf32> to vector<8x128xf32>
    %346 = vector.broadcast %6 : vector<1x128xf32> to vector<8x128xf32>
    %347 = arith.addf %345, %346 : vector<8x128xf32>
    %348 = arith.mulf %335, %347 : vector<8x128xf32>
    %349 = arith.addf %344, %348 : vector<8x128xf32>
    %350 = math.tanh %349 : vector<8x128xf32>
    %cst_95 = arith.constant 1.000000e+00 : f32
    %351 = vector.broadcast %cst_95 : f32 to vector<8x128xf32>
    %352 = arith.subf %351, %343 : vector<8x128xf32>
    %353 = arith.mulf %352, %350 : vector<8x128xf32>
    %354 = arith.mulf %343, %320 : vector<8x128xf32>
    %355 = arith.addf %353, %354 : vector<8x128xf32>
    %356 = arith.index_cast %c7_i32 : i32 to index
    %c0_96 = arith.constant 0 : index
    %c0_97 = arith.constant 0 : index
    %357 = vector.load %arg9[%356, %c0_96, %c0_97] : memref<8x8x128xf32, #tpu.memory_space<vmem>>, vector<1x8x128xf32>
    %358 = vector.shape_cast %357 : vector<1x8x128xf32> to vector<8x128xf32>
    %359 = vector.shape_cast %355 : vector<8x128xf32> to vector<1x8x128xf32>
    tpu.vector_store %arg9[%356, %c0_96, %c0_97], %359 {strides = array<i32>} : memref<8x8x128xf32, #tpu.memory_space<vmem>>, vector<1x8x128xf32>,
    %c8_i32 = arith.constant 8 : i32
    %c0_98 = arith.constant 0 : index
    %c0_99 = arith.constant 0 : index
    %360 = vector.load %arg10[%c0_98, %c0_99] : memref<8x128xf32, #tpu.memory_space<vmem>>, vector<8x128xf32>
    tpu.vector_store %arg10[%c0_98, %c0_99], %355 {strides = array<i32>} : memref<8x128xf32, #tpu.memory_space<vmem>>, vector<8x128xf32>,
    return
  }
  func.func @transform_0(%arg0: i32, %arg1: i32) -> (i32, i32, i32) {
    %c0_i32 = arith.constant 0 : i32
    %c0_i32_0 = arith.constant 0 : i32
    return %arg1, %arg0, %c0_i32 : i32, i32, i32
  }
  func.func @transform_1(%arg0: i32, %arg1: i32) -> (i32, i32, i32) {
    %c0_i32 = arith.constant 0 : i32
    %c0_i32_0 = arith.constant 0 : i32
    return %arg1, %arg0, %c0_i32 : i32, i32, i32
  }
  func.func @transform_2(%arg0: i32, %arg1: i32) -> (i32, i32) {
    %c0_i32 = arith.constant 0 : i32
    %c0_i32_0 = arith.constant 0 : i32
    return %arg0, %c0_i32 : i32, i32
  }
  func.func @transform_3(%arg0: i32, %arg1: i32) -> (i32, i32) {
    %c0_i32 = arith.constant 0 : i32
    %c0_i32_0 = arith.constant 0 : i32
    %c0_i32_1 = arith.constant 0 : i32
    return %c0_i32, %c0_i32_0 : i32, i32
  }
  func.func @transform_4(%arg0: i32, %arg1: i32) -> (i32, i32) {
    %c0_i32 = arith.constant 0 : i32
    %c0_i32_0 = arith.constant 0 : i32
    %c0_i32_1 = arith.constant 0 : i32
    return %c0_i32, %c0_i32_0 : i32, i32
  }
  func.func @transform_5(%arg0: i32, %arg1: i32) -> (i32, i32) {
    %c0_i32 = arith.constant 0 : i32
    %c0_i32_0 = arith.constant 0 : i32
    %c0_i32_1 = arith.constant 0 : i32
    return %c0_i32, %c0_i32_0 : i32, i32
  }
  func.func @transform_6(%arg0: i32, %arg1: i32) -> (i32, i32) {
    %c0_i32 = arith.constant 0 : i32
    %c0_i32_0 = arith.constant 0 : i32
    %c0_i32_1 = arith.constant 0 : i32
    return %c0_i32, %c0_i32_0 : i32, i32
  }
  func.func @transform_7(%arg0: i32, %arg1: i32) -> (i32, i32, i32) {
    %c0_i32 = arith.constant 0 : i32
    %c0_i32_0 = arith.constant 0 : i32
    return %arg1, %arg0, %c0_i32 : i32, i32, i32
  }
  func.func @transform_8(%arg0: i32, %arg1: i32) -> (i32, i32) {
    %c0_i32 = arith.constant 0 : i32
    %c0_i32_0 = arith.constant 0 : i32
    return %arg0, %c0_i32 : i32, i32
  }
}

</mosaic_0001>

<bundles_post_ra>
// kernel: tpu_custom_call.1
= control target key start
LH: loop header
LB: loop body
LE: loop exit
PB: predicated region body
PF: predicated region fallthrough
CT: control target
= control target key end

     0   :  { %14 = vsyncpa [#allocation3], 0  ;;  %s4799_s0 = inlined_call_operand.vmem [shape: f32[8,8,32], index: 0, kind: input, shape index: {}]   ;;  %s4800_s1 = inlined_call_operand.vmem [shape: f32[8,8,1], index: 1, kind: input, shape index: {}]   ;;  %s4801_s2 = inlined_call_operand.vmem [shape: f32[8,128], index: 2, kind: input, shape index: {}]   ;;  %s4802_s3 = inlined_call_operand.hbm [shape: f32[32,384], index: 3, kind: input, shape index: {}]   ;;  %s4803_s4 = inlined_call_operand.hbm [shape: f32[128,384], index: 4, kind: input, shape index: {}]   ;;  %s4804_s5 = inlined_call_operand.vmem [shape: f32[1,384], index: 5, kind: input, shape index: {}]   ;;  %s4805_s6 = inlined_call_operand.vmem [shape: f32[1,128], index: 6, kind: input, shape index: {}]   ;;  %s4806_s7 = inlined_call_operand.hbm [shape: f32[8,8,128], index: 7, kind: output, shape index: {0}]   ;;  %s4807_s8 = inlined_call_operand.hbm [shape: f32[8,128], index: 8, kind: output, shape index: {1}]  }
   0x1   :  { %15 = vsyncpa [#allocation6], 0 }
   0x2   :  { %16 = vsyncpa [#allocation4], 0 }
   0x3   :  { %17 = vsyncpa [#allocation9], 0  ;;  %s4106_s27 = smov [#allocation2]   ;;  %s4010_s9 = scalar_lea.hbm %s4802_s3, 1536 }
   0x4   :  { %s29_s28 = sshll.u32 %s4106_s27, 4  ;;  %p4011_p0 = scmp.ne.s32.totalorder %s4802_s3, %s4010_s9  ;;  %s30_s28 = int_to_ptr.vmem [resolvable:$true] %s29_s28 }
   0x5   :  { %p4014_p1 = scmp.lt.u32.totalorder %s4010_s9, %s4802_s3 }
   0x7   :  { %p4016_p2 = pnand %p4014_p1, %p4011_p0 }
   0x9   :  { %4019 = shalt.err (!%p4016_p2)
}
   0xa   :  { %s4020_s14 = scalar_lea.vmem %s30_s28, 1536  ;;  %p4025_p4 = scmp.lt.s32.totalorder %s30_s28, %s30_s28 }
   0xb   :  { %p4021_p3 = scmp.ne.s32.totalorder %s30_s28, %s4020_s14  ;;  %p4026_p5 = scmp.lt.s32.totalorder %s4020_s14, %s4020_s14 }
   0xd   :  { %p4027_p6 = por %p4026_p5, %p4025_p4 }
   0xf   :  { %p4028_p7 = pnand %p4027_p6, %p4021_p3 }
  0x11   :  { %4031 = shalt.err (!%p4028_p7)
}
  0x12   :  { %s4107_s15 = smov 384   ;;  %s4108_s16 = smov 24  }
  0x13   :  { %35 = dma.hbm_to_vmem [thread:$0]  %s4802_s3, 1536, %s30_s28, [#allocation3], %s4107_s15, %s4107_s15, %s4108_s16  }
  0x14   :  { %s4109_s19 = smov [#allocation5]   ;;  %s4032_s23 = scalar_lea.hbm %s4803_s4, 6144 }
  0x15   :  { %s41_s20 = sshll.u32 %s4109_s19, 4  ;;  %p4033_p8 = scmp.ne.s32.totalorder %s4803_s4, %s4032_s23  ;;  %s42_s20 = int_to_ptr.vmem [resolvable:$true] %s41_s20 }
  0x16   :  { %p4036_p9 = scmp.lt.u32.totalorder %s4032_s23, %s4803_s4 }
  0x18   :  { %p4038_p10 = pnand %p4036_p9, %p4033_p8 }
  0x1a   :  { %4041 = shalt.err (!%p4038_p10)
}
  0x1b   :  { %s4042_s29 = scalar_lea.vmem %s42_s20, 6144  ;;  %p4047_p12 = scmp.lt.s32.totalorder %s42_s20, %s42_s20 }
  0x1c   :  { %p4043_p11 = scmp.ne.s32.totalorder %s42_s20, %s4042_s29  ;;  %p4048_p13 = scmp.lt.s32.totalorder %s4042_s29, %s4042_s29 }
  0x1e   :  { %p4049_p0 = por %p4048_p13, %p4047_p12 }
  0x20   :  { %p4050_p1 = pnand %p4049_p0, %p4043_p11 }
  0x22   :  { %4053 = shalt.err (!%p4050_p1)
}
  0x23   :  { %47 = dma.hbm_to_vmem [thread:$0]  %s4803_s4, 6144, %s42_s20, [#allocation6], %s4107_s15, %s4107_s15, %s4108_s16  }
  0x24   :  { %4098 = dma.done.wait [#allocation3], 1536  }
  0x25   :  { %4099 = vsyncadd [#allocation3], 4294965760 }
  0x26   :  { %4100 = dma.done.wait [#allocation6], 6144  }
  0x27   :  { %4101 = vsyncadd [#allocation6], 4294961152  ;;  %v4110_v0 = vmov 0   ;;  %v4111_v1 = vmov 0.0|0.0   ;;  %v4112_v2 = vmov 0.0   ;;  %vm4113_vm0 = vmmov 0  }
  0x28   :  { %3927 = vset.pattern.permute.xlu0 %v4110_v0  ;;  %3331 = vmatprep.subr.bf16.mxu1 %v4111_v1  ;;  %v127_v3 = vld [vmem:[%s4800_s1] sm:$0xff]  ;;  %v2737_v4 = vld [vmem:[%s4800_s1 + $0x8] sm:$0xff]  ;;  %v67_v9 = vld [vmem:[#allocation2 + $0x18] sm:$0xff]  ;;  %vm151_vm1 = vcmask 261120   ;;  %s4115_s20 = smov [#allocation8]  }
  0x29   :  { %219 = vmatprep.mubr.f32.mxu0 %v4112_v2  ;;  %2963 = vmatprep.mubr.msk.f32.mxu1 %vm4113_vm0, %v4112_v2  ;;  %v65_v5 = vld [vmem:[#allocation2 + $0x8] sm:$0xff]  ;;  %v68_v6 = vld [vmem:[#allocation2 + $0x20] sm:$0xff]  ;;  %v66_v10 = vld [vmem:[#allocation2 + $0x10] sm:$0xff]  ;;  %s2718_s21 = sshll.u32 %s4115_s20, 4  ;;  %s4768_s21 = int_to_ptr.vmem [resolvable:$true] %s2718_s21 }
  0x2a   :  { %3928 = vset.pattern.permute.xlu1 %v4110_v0  ;;  %130 = vperm.xlu0 %3927, %v127_v3   ;;  %v4197_v7 = vpack.c.bf16 %v68_v6, %v65_v5  ;;  %v64_v8 = vld [vmem:[#allocation2] sm:$0xff]  ;;  %v69_v12 = vld [vmem:[#allocation2 + $0x28] sm:$0xff]  ;;  %v71_v13 = vld [vmem:[#allocation2 + $0x38] sm:$0xff] }
  0x2b   :  { %v4199_v11 = vpack.c.bf16 %v67_v9, %v64_v8  ;;  %v74_v14 = vld [vmem:[#allocation2 + $0x50] sm:$0xff]  ;;  %v4202_v15 = vpack.c.bf16 %v69_v12, %v66_v10  ;;  %v73_v18 = vld [vmem:[#allocation2 + $0x48] sm:$0xff]  ;;  %v72_v19 = vld [vmem:[#allocation2 + $0x40] sm:$0xff] }
  0x2c   :  { %3324 = vmatprep.subr.bf16.mxu0 %v4197_v7  ;;  %v4204_v16 = vpack.c.bf16 %v74_v14, %v71_v13  ;;  %v70_v17 = vld [vmem:[#allocation2 + $0x30] sm:$0xff]  ;;  %v75_v21 = vld [vmem:[#allocation2 + $0x58] sm:$0xff]  ;;  %v77_v22 = vld [vmem:[#allocation5 + $0x8] sm:$0xff] }
  0x2d   :  { %3326 = vmatpush1.bf16.msra.mxu0 %v4199_v11  ;;  %v4207_v20 = vpack.c.bf16 %v73_v18, %v70_v17  ;;  %v80_v23 = vld [vmem:[#allocation5 + $0x20] sm:$0xff]  ;;  %3333 = vmatpush3.bf16.msra.mxu1 %v4202_v15  ;;  %v4214_v25 = vpack.c.bf16 %v75_v21, %v72_v19  ;;  %v79_v28 = vld [vmem:[#allocation5 + $0x18] sm:$0xff]  ;;  %v78_v29 = vld [vmem:[#allocation5 + $0x10] sm:$0xff] }
  0x2e   :  { %470 = vperm.xlu0 %3927, %v2737_v4   ;;  %v2755_v24 = vld [vmem:[%s4800_s1 + $0x20] sm:$0xff]  ;;  %3328 = vmatprep.subr.bf16.mxu0 %v4204_v16  ;;  %v4216_v26 = vpack.c.bf16 %v80_v23, %v77_v22  ;;  %v81_v30 = vld [vmem:[#allocation5 + $0x28] sm:$0xff]  ;;  %v83_v31 = vld [vmem:[#allocation5 + $0x38] sm:$0xff] }
  0x2f   :  { %v76_v27 = vld [vmem:[#allocation5] sm:$0xff]  ;;  %3334 = vmatprep.subr.bf16.mxu1 %v4111_v1  ;;  %v86_v32 = vld [vmem:[#allocation5 + $0x50] sm:$0xff]  ;;  %v4230_v36 = vpack.c.bf16 %v81_v30, %v78_v29  ;;  %v85_v39 = vld [vmem:[#allocation5 + $0x48] sm:$0xff] }
  0x30   :  { %v134_v33 = vld [vmem:[%s4799_s0] sm:$0xff]  ;;  %v2767_v34 = vld [vmem:[%s4800_s1 + $0x30] sm:$0xff]  ;;  %v4228_v35 = vpack.c.bf16 %v79_v28, %v76_v27  ;;  %v4233_v38 = vpack.c.bf16 %v86_v32, %v83_v31  ;;  %v87_v41 = vld [vmem:[#allocation5 + $0x58] sm:$0xff] }
  0x31   :  { %3330 = vmatpush1.bf16.msra.mxu0 %v4207_v20  ;;  %3336 = vmatpush3.bf16.msra.mxu1 %v4214_v25  ;;  %v82_v37 = vld [vmem:[#allocation5 + $0x30] sm:$0xff]  ;;  %v84_v40 = vld [vmem:[#allocation5 + $0x40] sm:$0xff]  ;;  %v89_v42 = vld [vmem:[#allocation5 + $0x68] sm:$0xff] }
  0x32   :  { %1427 = vperm.xlu0 %3927, %v2755_v24   ;;  %3338 = vmatprep.subr.bf16.mxu0 %v4216_v26  ;;  %v92_v43 = vld [vmem:[#allocation5 + $0x80] sm:$0xff]  ;;  %v4239_v44 = vpack.c.bf16 %v85_v39, %v82_v37  ;;  %v4241_v45 = vpack.c.bf16 %v87_v41, %v84_v40  ;;  %v91_v48 = vld [vmem:[#allocation5 + $0x78] sm:$0xff]  ;;  %v90_v49 = vld [vmem:[#allocation5 + $0x70] sm:$0xff] }
  0x33   :  { %3369 = vmatprep.subr.bf16.mxu1 %v4111_v1  ;;  %v88_v46 = vld [vmem:[#allocation5 + $0x60] sm:$0xff]  ;;  %v4245_v47 = vpack.c.bf16 %v92_v43, %v89_v42  ;;  %v93_v50 = vld [vmem:[#allocation5 + $0x88] sm:$0xff]  ;;  %v95_v51 = vld [vmem:[#allocation5 + $0x98] sm:$0xff] }
  0x34   :  { %2732 = vmatmul.mubr.msk.f32.vlgmr.msra.gmra.mrb[0].mxu0 %vm151_vm1, %v134_v33  ;;  %2964 = vmatmul.mubr.msk.f32.vlgmr.msra.gmra.mrb[0].mxu1 %vm151_vm1, %v134_v33  ;;  %v98_v52 = vld [vmem:[#allocation5 + $0xb0] sm:$0xff]  ;;  %v4252_v53 = vpack.c.bf16 %v91_v48, %v88_v46  ;;  %v4254_v54 = vpack.c.bf16 %v93_v50, %v90_v49  ;;  %v97_v57 = vld [vmem:[#allocation5 + $0xa8] sm:$0xff]  ;;  %v96_v58 = vld [vmem:[#allocation5 + $0xa0] sm:$0xff] }
  0x35   :  { %3340 = vmatpush1.bf16.msra.mxu0 %v4228_v35  ;;  %3371 = vmatpush3.bf16.msra.mxu1 %v4230_v36  ;;  %v94_v55 = vld [vmem:[#allocation5 + $0x90] sm:$0xff]  ;;  %v4258_v56 = vpack.c.bf16 %v98_v52, %v95_v51  ;;  %v99_v59 = vld [vmem:[#allocation5 + $0xb8] sm:$0xff]  ;;  %v101_v60 = vld [vmem:[#allocation5 + $0xc8] sm:$0xff] }
  0x36   :  { %2065 = vperm.xlu0 %3927, %v2767_v34   ;;  %3342 = vmatprep.subr.bf16.mxu0 %v4233_v38  ;;  %v104_v61 = vld [vmem:[#allocation5 + $0xe0] sm:$0xff]  ;;  %v4262_v62 = vpack.c.bf16 %v97_v57, %v94_v55  ;;  %v4264_v63 = vpack.c.bf16 %v99_v59, %v96_v58  ;;  %v103_v4 = vld [vmem:[#allocation5 + $0xd8] sm:$0xff]  ;;  %v102_v5 = vld [vmem:[#allocation5 + $0xd0] sm:$0xff] }
  0x37   :  { %3372 = vmatprep.subr.bf16.mxu1 %v4111_v1  ;;  %360 = vmatprep.mubr.f32.mxu0 %v4112_v2  ;;  %v100_v0 = vld [vmem:[#allocation5 + $0xc0] sm:$0xff]  ;;  %v4268_v3 = vpack.c.bf16 %v104_v61, %v101_v60  ;;  %v105_v6 = vld [vmem:[#allocation5 + $0xe8] sm:$0xff]  ;;  %v107_v8 = vld [vmem:[#allocation5 + $0xf8] sm:$0xff] }
  0x38   :  { %2998 = vmatprep.mubr.msk.f32.mxu1 %vm4113_vm0, %v4112_v2  ;;  %v110_v9 = vld [vmem:[#allocation5 + $0x110] sm:$0xff]  ;;  %v4272_v10 = vpack.c.bf16 %v103_v4, %v100_v0  ;;  %v4274_v12 = vpack.c.bf16 %v105_v6, %v102_v5  ;;  %v109_v17 = vld [vmem:[#allocation5 + $0x108] sm:$0xff]  ;;  %v108_v18 = vld [vmem:[#allocation5 + $0x100] sm:$0xff]  ;;  %v136_v0 = vlaneseq }
  0x39   :  { %3344 = vmatpush1.bf16.msra.mxu0 %v4239_v44  ;;  %3374 = vmatpush3.bf16.msra.mxu1 %v4241_v45  ;;  %v106_v13 = vld [vmem:[#allocation5 + $0xf0] sm:$0xff]  ;;  %v4278_v14 = vpack.c.bf16 %v110_v9, %v107_v8  ;;  %v111_v19 = vld [vmem:[#allocation5 + $0x118] sm:$0xff]  ;;  %v113_v21 = vld [vmem:[#allocation5 + $0x128] sm:$0xff] }
  0x3a   :  { %3346 = vmatprep.subr.bf16.mxu0 %v4245_v47  ;;  %3375 = vmatprep.subr.bf16.mxu1 %v4111_v1  ;;  %v116_v22 = vld [vmem:[#allocation5 + $0x140] sm:$0xff]  ;;  %v4282_v23 = vpack.c.bf16 %v109_v17, %v106_v13  ;;  %v4284_v24 = vpack.c.bf16 %v111_v19, %v108_v18  ;;  %v115_v29 = vld [vmem:[#allocation5 + $0x138] sm:$0xff]  ;;  %v114_v30 = vld [vmem:[#allocation5 + $0x130] sm:$0xff]  ;;  %v137_v4 = vshrl.u32 %v136_v0, 7 }
  0x3b   :  { %v112_v27 = vld [vmem:[#allocation5 + $0x120] sm:$0xff]  ;;  %v4288_v28 = vpack.c.bf16 %v116_v22, %v113_v21  ;;  %v117_v31 = vld [vmem:[#allocation5 + $0x148] sm:$0xff]  ;;  %v119_v32 = vld [vmem:[#allocation5 + $0x158] sm:$0xff] }
  0x3c   :  { %v122_v33 = vld [vmem:[#allocation5 + $0x170] sm:$0xff]  ;;  %v4292_v34 = vpack.c.bf16 %v115_v29, %v112_v27  ;;  %v4294_v37 = vpack.c.bf16 %v117_v31, %v114_v30  ;;  %v121_v41 = vld [vmem:[#allocation5 + $0x168] sm:$0xff]  ;;  %v120_v42 = vld [vmem:[#allocation5 + $0x160] sm:$0xff]  ;;  %v138_v5 = vsub.s32 0, %v137_v4  ;;  %v142_v8 = vsub.s32 1, %v137_v4 }
  0x3d   :  { %3348 = vmatpush1.bf16.msra.mxu0 %v4252_v53  ;;  %3377 = vmatpush3.bf16.msra.mxu1 %v4254_v54  ;;  %v118_v39 = vld [vmem:[#allocation5 + $0x150] sm:$0xff]  ;;  %v4298_v40 = vpack.c.bf16 %v122_v33, %v119_v32  ;;  %v123_v43 = vld [vmem:[#allocation5 + $0x178] sm:$0xff]  ;;  %v62_v49 = vld [vmem:[%s4801_s2] sm:$0xff]  ;;  %v146_v33 = vsub.s32 2, %v137_v4  ;;  %s4114_s2 = smov [#allocation7]  }
  0x3e   :  { %3350 = vmatprep.subr.bf16.mxu0 %v4258_v56  ;;  %3378 = vmatprep.subr.bf16.mxu1 %v4111_v1  ;;  %v4302_v46 = vpack.c.bf16 %v121_v41, %v118_v39  ;;  %v4304_v48 = vpack.c.bf16 %v123_v43, %v120_v42  ;;  %v2738_v57 = vld [vmem:[%s4799_s0 + $0x8] sm:$0xff]  ;;  %v2743_v58 = vld [vmem:[%s4800_s1 + $0x10] sm:$0xff]  ;;  %v2749_v59 = vld [vmem:[%s4800_s1 + $0x18] sm:$0xff]  ;;  %s2705_s19 = sshll.u32 %s4114_s2, 4  ;;  %s2706_s19 = int_to_ptr.vmem [resolvable:$true] %s2705_s19 }
  0x3f   :  { %789 = vperm.xlu1 %3928, %v2743_v58   ;;  %v2761_v60 = vld [vmem:[%s4800_s1 + $0x28] sm:$0xff]  ;;  %v2773_v61 = vld [vmem:[%s4800_s1 + $0x38] sm:$0xff]  ;;  %v124_v6 = vld [vmem:[%s4804_s5] sm:$0x7]  ;;  %p4059_p3 = scmp.lt.s32.totalorder %s2706_s19, %s2706_s19 }
  0x40   :  { %v4387_v9 = vrot.slane %v124_v6, %v138_v5  ;;  %v4389_v18 = vrot.slane %v124_v6, %v142_v8  ;;  %v4396_v41 = vld [vmem:[%s4805_s6] ss:$0 sm:$0xff]  ;;  %v4398_v42 = vrot.slane %v124_v6, %v146_v33 }
  0x41   :  { %3352 = vmatpush1.bf16.msra.mxu0 %v4262_v62  ;;  %3380 = vmatpush3.bf16.msra.mxu1 %v4264_v63 }
  0x42   :  { %3354 = vmatprep.subr.bf16.mxu0 %v4268_v3  ;;  %3381 = vmatprep.subr.bf16.mxu1 %v4111_v1 }
  0x43   :  { %1108 = vperm.xlu1 %3928, %v2749_v59  }
  0x45   :  { %3356 = vmatpush1.bf16.msra.mxu0 %v4272_v10  ;;  %3383 = vmatpush3.bf16.msra.mxu1 %v4274_v12 }
  0x46   :  { %3358 = vmatprep.subr.bf16.mxu0 %v4278_v14  ;;  %3384 = vmatprep.subr.bf16.mxu1 %v4111_v1 }
  0x47   :  { %1746 = vperm.xlu1 %3928, %v2761_v60  }
  0x49   :  { %3360 = vmatpush1.bf16.msra.mxu0 %v4282_v23  ;;  %3386 = vmatpush3.bf16.msra.mxu1 %v4284_v24 }
  0x4a   :  { %3362 = vmatprep.subr.bf16.mxu0 %v4288_v28  ;;  %3387 = vmatprep.subr.bf16.mxu1 %v4111_v1 }
  0x4b   :  { %2384 = vperm.xlu1 %3928, %v2773_v61  }
  0x4d   :  { %3364 = vmatpush1.bf16.msra.mxu0 %v4292_v34  ;;  %3389 = vmatpush3.bf16.msra.mxu1 %v4294_v37 }
  0x4e   :  { %3366 = vmatprep.subr.bf16.mxu0 %v4298_v40  ;;  %3390 = vmatprep.subr.bf16.mxu1 %v4111_v1 }
  0x51   :  { %3368 = vmatpush1.bf16.msra.mxu0 %v4302_v46  ;;  %3392 = vmatpush3.bf16.msra.mxu1 %v4304_v48 }
  0x52   :  { %3394 = vmatprep.subr.bf16.mxu0 %v4197_v7  ;;  %3401 = vmatprep.subr.bf16.mxu1 %v4111_v1 }
  0xa9   :  { %v131_v50 = vpop.permute.xlu0 %130 }
  0xaa   :  { %v4315_v51 = vmul.f32 %v131_v50, %v62_v49 }
  0xac   :  { %361 = vmatmul.mubr.f32.vlgmr.msra.gmra.mrb[0].mxu0 %v4315_v51  ;;  %2999 = vmatmul.mubr.f32.vlgmr.msra.gmra.mrb[2].mxu1 %v4315_v51 }
  0xad   :  { %3396 = vmatpush1.bf16.msra.mxu0 %v4199_v11  ;;  %3403 = vmatpush3.bf16.msra.mxu1 %v4202_v15  ;;  %v471_v6 = vpop.permute.xlu0 %470 }
  0xae   :  { %3398 = vmatprep.subr.bf16.mxu0 %v4204_v16  ;;  %3404 = vmatprep.subr.bf16.mxu1 %v4111_v1 }
  0xaf   :  { %543 = vmatprep.mubr.f32.mxu0 %v4112_v2  ;;  %3009 = vmatprep.mubr.msk.f32.mxu1 %vm4113_vm0, %v4112_v2 }
  0xb1   :  { %3400 = vmatpush1.bf16.msra.mxu0 %v4207_v20  ;;  %3406 = vmatpush3.bf16.msra.mxu1 %v4214_v25 }
  0xb2   :  { %3408 = vmatprep.subr.bf16.mxu0 %v4216_v26  ;;  %3439 = vmatprep.subr.bf16.mxu1 %v4111_v1 }
  0xb4   :  { %2739 = vmatmul.mubr.msk.f32.vlgmr.msra.gmra.mrb[2].mxu0 %vm151_vm1, %v2738_v57  ;;  %3010 = vmatmul.mubr.msk.f32.vlgmr.msra.gmra.mrb[4].mxu1 %vm151_vm1, %v2738_v57 }
  0xb5   :  { %3410 = vmatpush1.bf16.msra.mxu0 %v4228_v35  ;;  %3441 = vmatpush3.bf16.msra.mxu1 %v4230_v36 }
  0xb6   :  { %3412 = vmatprep.subr.bf16.mxu0 %v4233_v38  ;;  %3442 = vmatprep.subr.bf16.mxu1 %v4111_v1 }
  0xb7   :  { %684 = vmatprep.mubr.f32.mxu0 %v4112_v2  ;;  %3044 = vmatprep.mubr.msk.f32.mxu1 %vm4113_vm0, %v4112_v2 }
  0xb9   :  { %3414 = vmatpush1.bf16.msra.mxu0 %v4239_v44  ;;  %3444 = vmatpush3.bf16.msra.mxu1 %v4241_v45 }
  0xba   :  { %3416 = vmatprep.subr.bf16.mxu0 %v4245_v47  ;;  %3445 = vmatprep.subr.bf16.mxu1 %v4111_v1 }
  0xbd   :  { %3418 = vmatpush1.bf16.msra.mxu0 %v4252_v53  ;;  %3447 = vmatpush3.bf16.msra.mxu1 %v4254_v54 }
  0xbe   :  { %3420 = vmatprep.subr.bf16.mxu0 %v4258_v56  ;;  %3448 = vmatprep.subr.bf16.mxu1 %v4111_v1 }
  0xc1   :  { %3422 = vmatpush1.bf16.msra.mxu0 %v4262_v62  ;;  %3450 = vmatpush3.bf16.msra.mxu1 %v4264_v63 }
  0xc2   :  { %3424 = vmatprep.subr.bf16.mxu0 %v4268_v3  ;;  %3451 = vmatprep.subr.bf16.mxu1 %v4111_v1 }
  0xc5   :  { %3426 = vmatpush1.bf16.msra.mxu0 %v4272_v10  ;;  %3453 = vmatpush3.bf16.msra.mxu1 %v4274_v12 }
  0xc6   :  { %3428 = vmatprep.subr.bf16.mxu0 %v4278_v14  ;;  %3454 = vmatprep.subr.bf16.mxu1 %v4111_v1 }
  0xc9   :  { %3430 = vmatpush1.bf16.msra.mxu0 %v4282_v23  ;;  %3456 = vmatpush3.bf16.msra.mxu1 %v4284_v24 }
  0xca   :  { %3432 = vmatprep.subr.bf16.mxu0 %v4288_v28  ;;  %3457 = vmatprep.subr.bf16.mxu1 %v4111_v1 }
  0xcd   :  { %3434 = vmatpush1.bf16.msra.mxu0 %v4292_v34  ;;  %3459 = vmatpush3.bf16.msra.mxu1 %v4294_v37 }
  0xce   :  { %3436 = vmatprep.subr.bf16.mxu0 %v4298_v40  ;;  %3460 = vmatprep.subr.bf16.mxu1 %v4111_v1 }
  0xd1   :  { %3438 = vmatpush1.bf16.msra.mxu0 %v4302_v46  ;;  %3462 = vmatpush3.bf16.msra.mxu1 %v4304_v48 }
  0xd2   :  { %3464 = vmatprep.subr.bf16.mxu0 %v4197_v7  ;;  %3471 = vmatprep.subr.bf16.mxu1 %v4111_v1 }
 0x107   :  { %v4330_v52 = vpop.f32.mrb[0].mxu1 }
 0x108   :  { %v2965_v55 = vpop.f32.mrb[1].mxu1 }
 0x109   :  { %v293_v55 = vadd.f32 %v4330_v52, %v4398_v42 }
 0x17f   :  { %v362_v13 = vpop.f32.mrb[0].mxu0  ;;  %v433_v17 = vpop.f32.mrb[2].mxu1 }
 0x180   :  { %v3883_v19 = vadd.f32 %v362_v13, %v4387_v9  ;;  %v364_v21 = vpop.f32.mrb[1].mxu0  ;;  %v3000_v22 = vpop.f32.mrb[3].mxu1  ;;  %v457_v49 = vadd.f32 %v4396_v41, %v433_v17  ;;  %v2744_v13 = vld [vmem:[%s4799_s0 + $0x10] sm:$0xff] }
 0x181   :  { %v3884_v29 = vadd.f32 %v364_v21, %v4389_v18 }
 0x182   :  { %v2734_v27 = vmul.f32 -1.442695, %v3883_v19 }
 0x183   :  { %v2735_v30 = vmul.f32 -1.442695, %v3884_v29 }
 0x184   :  { %3929 = vpow2.f32 %v2734_v27 }
 0x185   :  { %3931 = vpow2.f32 %v2735_v30 }
 0x18e   :  { %v3930_v31 = vpop.eup %3929 }
 0x18f   :  { %v441_v32 = vadd.f32 1.0, %v3930_v31  ;;  %v3932_v39 = vpop.eup %3931 }
 0x190   :  { %v448_v43 = vadd.f32 1.0, %v3932_v39 }
 0x191   :  { %3933 = vrcp.f32 %v441_v32 }
 0x192   :  { %3935 = vrcp.f32 %v448_v43 }
 0x19b   :  { %v3934_v50 = vpop.eup %3933 }
 0x19c   :  { %v458_v57 = vmul.f32 %v3934_v50, %v457_v49  ;;  %v3936_v59 = vpop.eup %3935 }
 0x19d   :  { %v461_v60 = vsub.f32 1.0, %v3936_v59  ;;  %v463_v4 = vmul.f32 %v3936_v59, %v4315_v51  ;;  %v616_v51 = vpop.f32.mrb[4].mxu1 }
 0x19e   :  { %v459_v58 = vadd.f32 %v458_v57, %v293_v55  ;;  %v3011_v52 = vpop.f32.mrb[5].mxu1  ;;  %v617_v55 = vadd.f32 %v616_v51, %v4398_v42 }
 0x1a0   :  { %3937 = vtanh.f32 %v459_v58 }
 0x1aa   :  { %v3938_v61 = vpop.eup %3937 }
 0x1ab   :  { %v462_v0 = vmul.f32 %v3938_v61, %v461_v60 }
 0x1ad   :  { %v464_v5 = vadd.f32 %v463_v4, %v462_v0 }
 0x1af   :  { %465 = vst [vmem:[#allocation7] sm:$0xff] %v464_v5  ;;  %v4404_v8 = vmul.f32 %v471_v6, %v464_v5  ;;  %v790_v6 = vpop.permute.xlu1 %789 }
 0x1b1   :  { %685 = vmatmul.mubr.f32.vlgmr.msra.gmra.mrb[2].mxu0 %v4404_v8  ;;  %3045 = vmatmul.mubr.f32.vlgmr.msra.gmra.mrb[6].mxu1 %v4404_v8 }
 0x1b2   :  { %3466 = vmatpush1.bf16.msra.mxu0 %v4199_v11  ;;  %3473 = vmatpush3.bf16.msra.mxu1 %v4202_v15 }
 0x1b3   :  { %3468 = vmatprep.subr.bf16.mxu0 %v4204_v16  ;;  %3474 = vmatprep.subr.bf16.mxu1 %v4111_v1 }
 0x1b4   :  { %862 = vmatprep.mubr.f32.mxu0 %v4112_v2  ;;  %3055 = vmatprep.mubr.msk.f32.mxu1 %vm4113_vm0, %v4112_v2 }
 0x1b6   :  { %3470 = vmatpush1.bf16.msra.mxu0 %v4207_v20  ;;  %3476 = vmatpush3.bf16.msra.mxu1 %v4214_v25 }
 0x1b7   :  { %3478 = vmatprep.subr.bf16.mxu0 %v4216_v26  ;;  %3509 = vmatprep.subr.bf16.mxu1 %v4111_v1 }
 0x1b9   :  { %2745 = vmatmul.mubr.msk.f32.vlgmr.msra.gmra.mrb[4].mxu0 %vm151_vm1, %v2744_v13  ;;  %3056 = vmatmul.mubr.msk.f32.vlgmr.msra.gmra.mrb[8].mxu1 %vm151_vm1, %v2744_v13  ;;  %v2750_v13 = vld [vmem:[%s4799_s0 + $0x18] sm:$0xff] }
 0x1ba   :  { %3480 = vmatpush1.bf16.msra.mxu0 %v4228_v35  ;;  %3511 = vmatpush3.bf16.msra.mxu1 %v4230_v36 }
 0x1bb   :  { %3482 = vmatprep.subr.bf16.mxu0 %v4233_v38  ;;  %3512 = vmatprep.subr.bf16.mxu1 %v4111_v1 }
 0x1bc   :  { %1003 = vmatprep.mubr.f32.mxu0 %v4112_v2  ;;  %3090 = vmatprep.mubr.msk.f32.mxu1 %vm4113_vm0, %v4112_v2 }
 0x1be   :  { %3484 = vmatpush1.bf16.msra.mxu0 %v4239_v44  ;;  %3514 = vmatpush3.bf16.msra.mxu1 %v4241_v45 }
 0x1bf   :  { %3486 = vmatprep.subr.bf16.mxu0 %v4245_v47  ;;  %3515 = vmatprep.subr.bf16.mxu1 %v4111_v1 }
 0x1c2   :  { %3488 = vmatpush1.bf16.msra.mxu0 %v4252_v53  ;;  %3517 = vmatpush3.bf16.msra.mxu1 %v4254_v54 }
 0x1c3   :  { %3490 = vmatprep.subr.bf16.mxu0 %v4258_v56  ;;  %3518 = vmatprep.subr.bf16.mxu1 %v4111_v1 }
 0x1c6   :  { %3492 = vmatpush1.bf16.msra.mxu0 %v4262_v62  ;;  %3520 = vmatpush3.bf16.msra.mxu1 %v4264_v63 }
 0x1c7   :  { %3494 = vmatprep.subr.bf16.mxu0 %v4268_v3  ;;  %3521 = vmatprep.subr.bf16.mxu1 %v4111_v1 }
 0x1ca   :  { %3496 = vmatpush1.bf16.msra.mxu0 %v4272_v10  ;;  %3523 = vmatpush3.bf16.msra.mxu1 %v4274_v12 }
 0x1cb   :  { %3498 = vmatprep.subr.bf16.mxu0 %v4278_v14  ;;  %3524 = vmatprep.subr.bf16.mxu1 %v4111_v1 }
 0x1ce   :  { %3500 = vmatpush1.bf16.msra.mxu0 %v4282_v23  ;;  %3526 = vmatpush3.bf16.msra.mxu1 %v4284_v24 }
 0x1cf   :  { %3502 = vmatprep.subr.bf16.mxu0 %v4288_v28  ;;  %3527 = vmatprep.subr.bf16.mxu1 %v4111_v1 }
 0x1d2   :  { %3504 = vmatpush1.bf16.msra.mxu0 %v4292_v34  ;;  %3529 = vmatpush3.bf16.msra.mxu1 %v4294_v37 }
 0x1d3   :  { %3506 = vmatprep.subr.bf16.mxu0 %v4298_v40  ;;  %3530 = vmatprep.subr.bf16.mxu1 %v4111_v1 }
 0x1d6   :  { %3508 = vmatpush1.bf16.msra.mxu0 %v4302_v46  ;;  %3532 = vmatpush3.bf16.msra.mxu1 %v4304_v48 }
 0x1d7   :  { %3534 = vmatprep.subr.bf16.mxu0 %v4197_v7  ;;  %3541 = vmatprep.subr.bf16.mxu1 %v4111_v1 }
 0x284   :  { %v686_v17 = vpop.f32.mrb[2].mxu0  ;;  %v757_v19 = vpop.f32.mrb[6].mxu1 }
 0x285   :  { %v3885_v21 = vadd.f32 %v686_v17, %v4387_v9  ;;  %v688_v22 = vpop.f32.mrb[3].mxu0  ;;  %v3046_v27 = vpop.f32.mrb[7].mxu1  ;;  %v775_v49 = vadd.f32 %v4396_v41, %v757_v19 }
 0x286   :  { %v3886_v30 = vadd.f32 %v688_v22, %v4389_v18 }
 0x287   :  { %v2741_v29 = vmul.f32 -1.442695, %v3885_v21 }
 0x288   :  { %v2742_v31 = vmul.f32 -1.442695, %v3886_v30 }
 0x289   :  { %3939 = vpow2.f32 %v2741_v29 }
 0x28a   :  { %3941 = vpow2.f32 %v2742_v31 }
 0x293   :  { %v3940_v32 = vpop.eup %3939 }
 0x294   :  { %v765_v33 = vadd.f32 1.0, %v3940_v32  ;;  %v3942_v39 = vpop.eup %3941 }
 0x295   :  { %v772_v43 = vadd.f32 1.0, %v3942_v39 }
 0x296   :  { %3943 = vrcp.f32 %v765_v33 }
 0x297   :  { %3945 = vrcp.f32 %v772_v43 }
 0x2a0   :  { %v3944_v50 = vpop.eup %3943 }
 0x2a1   :  { %v776_v57 = vmul.f32 %v3944_v50, %v775_v49  ;;  %v3946_v59 = vpop.eup %3945 }
 0x2a2   :  { %v779_v60 = vsub.f32 1.0, %v3946_v59  ;;  %v781_v4 = vmul.f32 %v3946_v59, %v4404_v8  ;;  %v935_v8 = vpop.f32.mrb[8].mxu1 }
 0x2a3   :  { %v777_v58 = vadd.f32 %v776_v57, %v617_v55  ;;  %v3057_v51 = vpop.f32.mrb[9].mxu1  ;;  %v936_v55 = vadd.f32 %v935_v8, %v4398_v42 }
 0x2a5   :  { %3947 = vtanh.f32 %v777_v58 }
 0x2af   :  { %v3948_v61 = vpop.eup %3947 }
 0x2b0   :  { %v780_v0 = vmul.f32 %v3948_v61, %v779_v60 }
 0x2b2   :  { %v782_v5 = vadd.f32 %v781_v4, %v780_v0 }
 0x2b4   :  { %784 = vst [vmem:[#allocation7 + $0x8] sm:$0xff] %v782_v5  ;;  %v4464_v52 = vmul.f32 %v790_v6, %v782_v5  ;;  %v1109_v6 = vpop.permute.xlu1 %1108 }
 0x2b6   :  { %1004 = vmatmul.mubr.f32.vlgmr.msra.gmra.mrb[4].mxu0 %v4464_v52  ;;  %3091 = vmatmul.mubr.f32.vlgmr.msra.gmra.mrb[10].mxu1 %v4464_v52 }
 0x2b7   :  { %3536 = vmatpush1.bf16.msra.mxu0 %v4199_v11  ;;  %3543 = vmatpush3.bf16.msra.mxu1 %v4202_v15 }
 0x2b8   :  { %3538 = vmatprep.subr.bf16.mxu0 %v4204_v16  ;;  %3544 = vmatprep.subr.bf16.mxu1 %v4111_v1 }
 0x2b9   :  { %1181 = vmatprep.mubr.f32.mxu0 %v4112_v2  ;;  %3101 = vmatprep.mubr.msk.f32.mxu1 %vm4113_vm0, %v4112_v2 }
 0x2bb   :  { %3540 = vmatpush1.bf16.msra.mxu0 %v4207_v20  ;;  %3546 = vmatpush3.bf16.msra.mxu1 %v4214_v25 }
 0x2bc   :  { %3548 = vmatprep.subr.bf16.mxu0 %v4216_v26  ;;  %3579 = vmatprep.subr.bf16.mxu1 %v4111_v1 }
 0x2be   :  { %2751 = vmatmul.mubr.msk.f32.vlgmr.msra.gmra.mrb[6].mxu0 %vm151_vm1, %v2750_v13  ;;  %3102 = vmatmul.mubr.msk.f32.vlgmr.msra.gmra.mrb[12].mxu1 %vm151_vm1, %v2750_v13  ;;  %v2756_v13 = vld [vmem:[%s4799_s0 + $0x20] sm:$0xff] }
 0x2bf   :  { %3550 = vmatpush1.bf16.msra.mxu0 %v4228_v35  ;;  %3581 = vmatpush3.bf16.msra.mxu1 %v4230_v36 }
 0x2c0   :  { %3552 = vmatprep.subr.bf16.mxu0 %v4233_v38  ;;  %3582 = vmatprep.subr.bf16.mxu1 %v4111_v1 }
 0x2c1   :  { %1322 = vmatprep.mubr.f32.mxu0 %v4112_v2  ;;  %3136 = vmatprep.mubr.msk.f32.mxu1 %vm4113_vm0, %v4112_v2 }
 0x2c3   :  { %3554 = vmatpush1.bf16.msra.mxu0 %v4239_v44  ;;  %3584 = vmatpush3.bf16.msra.mxu1 %v4241_v45 }
 0x2c4   :  { %3556 = vmatprep.subr.bf16.mxu0 %v4245_v47  ;;  %3585 = vmatprep.subr.bf16.mxu1 %v4111_v1 }
 0x2c7   :  { %3558 = vmatpush1.bf16.msra.mxu0 %v4252_v53  ;;  %3587 = vmatpush3.bf16.msra.mxu1 %v4254_v54 }
 0x2c8   :  { %3560 = vmatprep.subr.bf16.mxu0 %v4258_v56  ;;  %3588 = vmatprep.subr.bf16.mxu1 %v4111_v1 }
 0x2cb   :  { %3562 = vmatpush1.bf16.msra.mxu0 %v4262_v62  ;;  %3590 = vmatpush3.bf16.msra.mxu1 %v4264_v63 }
 0x2cc   :  { %3564 = vmatprep.subr.bf16.mxu0 %v4268_v3  ;;  %3591 = vmatprep.subr.bf16.mxu1 %v4111_v1 }
 0x2cf   :  { %3566 = vmatpush1.bf16.msra.mxu0 %v4272_v10  ;;  %3593 = vmatpush3.bf16.msra.mxu1 %v4274_v12 }
 0x2d0   :  { %3568 = vmatprep.subr.bf16.mxu0 %v4278_v14  ;;  %3594 = vmatprep.subr.bf16.mxu1 %v4111_v1 }
 0x2d3   :  { %3570 = vmatpush1.bf16.msra.mxu0 %v4282_v23  ;;  %3596 = vmatpush3.bf16.msra.mxu1 %v4284_v24 }
 0x2d4   :  { %3572 = vmatprep.subr.bf16.mxu0 %v4288_v28  ;;  %3597 = vmatprep.subr.bf16.mxu1 %v4111_v1 }
 0x2d7   :  { %3574 = vmatpush1.bf16.msra.mxu0 %v4292_v34  ;;  %3599 = vmatpush3.bf16.msra.mxu1 %v4294_v37 }
 0x2d8   :  { %3576 = vmatprep.subr.bf16.mxu0 %v4298_v40  ;;  %3600 = vmatprep.subr.bf16.mxu1 %v4111_v1 }
 0x2db   :  { %3578 = vmatpush1.bf16.msra.mxu0 %v4302_v46  ;;  %3602 = vmatpush3.bf16.msra.mxu1 %v4304_v48 }
 0x2dc   :  { %3604 = vmatprep.subr.bf16.mxu0 %v4197_v7  ;;  %3611 = vmatprep.subr.bf16.mxu1 %v4111_v1 }
 0x389   :  { %v1005_v17 = vpop.f32.mrb[4].mxu0  ;;  %v1076_v19 = vpop.f32.mrb[10].mxu1 }
 0x38a   :  { %v3887_v21 = vadd.f32 %v1005_v17, %v4387_v9  ;;  %v1007_v22 = vpop.f32.mrb[5].mxu0  ;;  %v3092_v27 = vpop.f32.mrb[11].mxu1  ;;  %v1094_v49 = vadd.f32 %v4396_v41, %v1076_v19 }
 0x38b   :  { %v3888_v30 = vadd.f32 %v1007_v22, %v4389_v18 }
 0x38c   :  { %v2747_v29 = vmul.f32 -1.442695, %v3887_v21 }
 0x38d   :  { %v2748_v31 = vmul.f32 -1.442695, %v3888_v30 }
 0x38e   :  { %3949 = vpow2.f32 %v2747_v29 }
 0x38f   :  { %3951 = vpow2.f32 %v2748_v31 }
 0x398   :  { %v3950_v32 = vpop.eup %3949 }
 0x399   :  { %v1084_v33 = vadd.f32 1.0, %v3950_v32  ;;  %v3952_v39 = vpop.eup %3951 }
 0x39a   :  { %v1091_v43 = vadd.f32 1.0, %v3952_v39 }
 0x39b   :  { %3953 = vrcp.f32 %v1084_v33 }
 0x39c   :  { %3955 = vrcp.f32 %v1091_v43 }
 0x3a5   :  { %v3954_v50 = vpop.eup %3953 }
 0x3a6   :  { %v1095_v57 = vmul.f32 %v3954_v50, %v1094_v49  ;;  %v3956_v59 = vpop.eup %3955 }
 0x3a7   :  { %v1098_v60 = vsub.f32 1.0, %v3956_v59  ;;  %v1100_v4 = vmul.f32 %v3956_v59, %v4464_v52  ;;  %v1254_v52 = vpop.f32.mrb[12].mxu1 }
 0x3a8   :  { %v1096_v58 = vadd.f32 %v1095_v57, %v936_v55  ;;  %v3103_v8 = vpop.f32.mrb[13].mxu1  ;;  %v1255_v55 = vadd.f32 %v1254_v52, %v4398_v42 }
 0x3aa   :  { %3957 = vtanh.f32 %v1096_v58 }
 0x3b4   :  { %v3958_v61 = vpop.eup %3957 }
 0x3b5   :  { %v1099_v0 = vmul.f32 %v3958_v61, %v1098_v60 }
 0x3b7   :  { %v1101_v5 = vadd.f32 %v1100_v4, %v1099_v0 }
 0x3b9   :  { %1103 = vst [vmem:[#allocation7 + $0x10] sm:$0xff] %v1101_v5  ;;  %v4524_v51 = vmul.f32 %v1109_v6, %v1101_v5  ;;  %v1428_v6 = vpop.permute.xlu0 %1427 }
 0x3bb   :  { %1323 = vmatmul.mubr.f32.vlgmr.msra.gmra.mrb[6].mxu0 %v4524_v51  ;;  %3137 = vmatmul.mubr.f32.vlgmr.msra.gmra.mrb[14].mxu1 %v4524_v51 }
 0x3bc   :  { %3606 = vmatpush1.bf16.msra.mxu0 %v4199_v11  ;;  %3613 = vmatpush3.bf16.msra.mxu1 %v4202_v15 }
 0x3bd   :  { %3608 = vmatprep.subr.bf16.mxu0 %v4204_v16  ;;  %3614 = vmatprep.subr.bf16.mxu1 %v4111_v1 }
 0x3be   :  { %1500 = vmatprep.mubr.f32.mxu0 %v4112_v2  ;;  %3147 = vmatprep.mubr.msk.f32.mxu1 %vm4113_vm0, %v4112_v2 }
 0x3c0   :  { %3610 = vmatpush1.bf16.msra.mxu0 %v4207_v20  ;;  %3616 = vmatpush3.bf16.msra.mxu1 %v4214_v25 }
 0x3c1   :  { %3618 = vmatprep.subr.bf16.mxu0 %v4216_v26  ;;  %3649 = vmatprep.subr.bf16.mxu1 %v4111_v1 }
 0x3c3   :  { %2757 = vmatmul.mubr.msk.f32.vlgmr.msra.gmra.mrb[8].mxu0 %vm151_vm1, %v2756_v13  ;;  %3148 = vmatmul.mubr.msk.f32.vlgmr.msra.gmra.mrb[16].mxu1 %vm151_vm1, %v2756_v13  ;;  %v2762_v13 = vld [vmem:[%s4799_s0 + $0x28] sm:$0xff] }
 0x3c4   :  { %3620 = vmatpush1.bf16.msra.mxu0 %v4228_v35  ;;  %3651 = vmatpush3.bf16.msra.mxu1 %v4230_v36 }
 0x3c5   :  { %3622 = vmatprep.subr.bf16.mxu0 %v4233_v38  ;;  %3652 = vmatprep.subr.bf16.mxu1 %v4111_v1 }
 0x3c6   :  { %1641 = vmatprep.mubr.f32.mxu0 %v4112_v2  ;;  %3182 = vmatprep.mubr.msk.f32.mxu1 %vm4113_vm0, %v4112_v2 }
 0x3c8   :  { %3624 = vmatpush1.bf16.msra.mxu0 %v4239_v44  ;;  %3654 = vmatpush3.bf16.msra.mxu1 %v4241_v45 }
 0x3c9   :  { %3626 = vmatprep.subr.bf16.mxu0 %v4245_v47  ;;  %3655 = vmatprep.subr.bf16.mxu1 %v4111_v1 }
 0x3cc   :  { %3628 = vmatpush1.bf16.msra.mxu0 %v4252_v53  ;;  %3657 = vmatpush3.bf16.msra.mxu1 %v4254_v54 }
 0x3cd   :  { %3630 = vmatprep.subr.bf16.mxu0 %v4258_v56  ;;  %3658 = vmatprep.subr.bf16.mxu1 %v4111_v1 }
 0x3d0   :  { %3632 = vmatpush1.bf16.msra.mxu0 %v4262_v62  ;;  %3660 = vmatpush3.bf16.msra.mxu1 %v4264_v63 }
 0x3d1   :  { %3634 = vmatprep.subr.bf16.mxu0 %v4268_v3  ;;  %3661 = vmatprep.subr.bf16.mxu1 %v4111_v1 }
 0x3d4   :  { %3636 = vmatpush1.bf16.msra.mxu0 %v4272_v10  ;;  %3663 = vmatpush3.bf16.msra.mxu1 %v4274_v12 }
 0x3d5   :  { %3638 = vmatprep.subr.bf16.mxu0 %v4278_v14  ;;  %3664 = vmatprep.subr.bf16.mxu1 %v4111_v1 }
 0x3d8   :  { %3640 = vmatpush1.bf16.msra.mxu0 %v4282_v23  ;;  %3666 = vmatpush3.bf16.msra.mxu1 %v4284_v24 }
 0x3d9   :  { %3642 = vmatprep.subr.bf16.mxu0 %v4288_v28  ;;  %3667 = vmatprep.subr.bf16.mxu1 %v4111_v1 }
 0x3dc   :  { %3644 = vmatpush1.bf16.msra.mxu0 %v4292_v34  ;;  %3669 = vmatpush3.bf16.msra.mxu1 %v4294_v37 }
 0x3dd   :  { %3646 = vmatprep.subr.bf16.mxu0 %v4298_v40  ;;  %3670 = vmatprep.subr.bf16.mxu1 %v4111_v1 }
 0x3e0   :  { %3648 = vmatpush1.bf16.msra.mxu0 %v4302_v46  ;;  %3672 = vmatpush3.bf16.msra.mxu1 %v4304_v48 }
 0x3e1   :  { %3674 = vmatprep.subr.bf16.mxu0 %v4197_v7  ;;  %3681 = vmatprep.subr.bf16.mxu1 %v4111_v1 }
 0x48e   :  { %v1324_v17 = vpop.f32.mrb[6].mxu0  ;;  %v1395_v19 = vpop.f32.mrb[14].mxu1 }
 0x48f   :  { %v3889_v21 = vadd.f32 %v1324_v17, %v4387_v9  ;;  %v1326_v22 = vpop.f32.mrb[7].mxu0  ;;  %v3138_v27 = vpop.f32.mrb[15].mxu1  ;;  %v1413_v49 = vadd.f32 %v4396_v41, %v1395_v19 }
 0x490   :  { %v3890_v30 = vadd.f32 %v1326_v22, %v4389_v18 }
 0x491   :  { %v2753_v29 = vmul.f32 -1.442695, %v3889_v21 }
 0x492   :  { %v2754_v31 = vmul.f32 -1.442695, %v3890_v30 }
 0x493   :  { %3959 = vpow2.f32 %v2753_v29 }
 0x494   :  { %3961 = vpow2.f32 %v2754_v31 }
 0x49d   :  { %v3960_v32 = vpop.eup %3959 }
 0x49e   :  { %v1403_v33 = vadd.f32 1.0, %v3960_v32  ;;  %v3962_v39 = vpop.eup %3961 }
 0x49f   :  { %v1410_v43 = vadd.f32 1.0, %v3962_v39 }
 0x4a0   :  { %3963 = vrcp.f32 %v1403_v33 }
 0x4a1   :  { %3965 = vrcp.f32 %v1410_v43 }
 0x4aa   :  { %v3964_v50 = vpop.eup %3963 }
 0x4ab   :  { %v1414_v57 = vmul.f32 %v3964_v50, %v1413_v49  ;;  %v3966_v59 = vpop.eup %3965 }
 0x4ac   :  { %v1417_v60 = vsub.f32 1.0, %v3966_v59  ;;  %v1419_v4 = vmul.f32 %v3966_v59, %v4524_v51  ;;  %v1573_v51 = vpop.f32.mrb[16].mxu1 }
 0x4ad   :  { %v1415_v58 = vadd.f32 %v1414_v57, %v1255_v55  ;;  %v3149_v52 = vpop.f32.mrb[17].mxu1  ;;  %v1574_v55 = vadd.f32 %v1573_v51, %v4398_v42 }
 0x4af   :  { %3967 = vtanh.f32 %v1415_v58 }
 0x4b9   :  { %v3968_v61 = vpop.eup %3967 }
 0x4ba   :  { %v1418_v0 = vmul.f32 %v3968_v61, %v1417_v60 }
 0x4bc   :  { %v1420_v5 = vadd.f32 %v1419_v4, %v1418_v0 }
 0x4be   :  { %1422 = vst [vmem:[#allocation7 + $0x18] sm:$0xff] %v1420_v5  ;;  %v4584_v8 = vmul.f32 %v1428_v6, %v1420_v5  ;;  %v1747_v6 = vpop.permute.xlu1 %1746 }
 0x4c0   :  { %1642 = vmatmul.mubr.f32.vlgmr.msra.gmra.mrb[8].mxu0 %v4584_v8  ;;  %3183 = vmatmul.mubr.f32.vlgmr.msra.gmra.mrb[18].mxu1 %v4584_v8 }
 0x4c1   :  { %3676 = vmatpush1.bf16.msra.mxu0 %v4199_v11  ;;  %3683 = vmatpush3.bf16.msra.mxu1 %v4202_v15 }
 0x4c2   :  { %3678 = vmatprep.subr.bf16.mxu0 %v4204_v16  ;;  %3684 = vmatprep.subr.bf16.mxu1 %v4111_v1 }
 0x4c3   :  { %1819 = vmatprep.mubr.f32.mxu0 %v4112_v2  ;;  %3193 = vmatprep.mubr.msk.f32.mxu1 %vm4113_vm0, %v4112_v2 }
 0x4c5   :  { %3680 = vmatpush1.bf16.msra.mxu0 %v4207_v20  ;;  %3686 = vmatpush3.bf16.msra.mxu1 %v4214_v25 }
 0x4c6   :  { %3688 = vmatprep.subr.bf16.mxu0 %v4216_v26  ;;  %3719 = vmatprep.subr.bf16.mxu1 %v4111_v1 }
 0x4c8   :  { %2763 = vmatmul.mubr.msk.f32.vlgmr.msra.gmra.mrb[10].mxu0 %vm151_vm1, %v2762_v13  ;;  %3194 = vmatmul.mubr.msk.f32.vlgmr.msra.gmra.mrb[20].mxu1 %vm151_vm1, %v2762_v13  ;;  %v2768_v13 = vld [vmem:[%s4799_s0 + $0x30] sm:$0xff] }
 0x4c9   :  { %3690 = vmatpush1.bf16.msra.mxu0 %v4228_v35  ;;  %3721 = vmatpush3.bf16.msra.mxu1 %v4230_v36 }
 0x4ca   :  { %3692 = vmatprep.subr.bf16.mxu0 %v4233_v38  ;;  %3722 = vmatprep.subr.bf16.mxu1 %v4111_v1 }
 0x4cb   :  { %1960 = vmatprep.mubr.f32.mxu0 %v4112_v2  ;;  %3228 = vmatprep.mubr.msk.f32.mxu1 %vm4113_vm0, %v4112_v2 }
 0x4cd   :  { %3694 = vmatpush1.bf16.msra.mxu0 %v4239_v44  ;;  %3724 = vmatpush3.bf16.msra.mxu1 %v4241_v45 }
 0x4ce   :  { %3696 = vmatprep.subr.bf16.mxu0 %v4245_v47  ;;  %3725 = vmatprep.subr.bf16.mxu1 %v4111_v1 }
 0x4d1   :  { %3698 = vmatpush1.bf16.msra.mxu0 %v4252_v53  ;;  %3727 = vmatpush3.bf16.msra.mxu1 %v4254_v54 }
 0x4d2   :  { %3700 = vmatprep.subr.bf16.mxu0 %v4258_v56  ;;  %3728 = vmatprep.subr.bf16.mxu1 %v4111_v1 }
 0x4d5   :  { %3702 = vmatpush1.bf16.msra.mxu0 %v4262_v62  ;;  %3730 = vmatpush3.bf16.msra.mxu1 %v4264_v63 }
 0x4d6   :  { %3704 = vmatprep.subr.bf16.mxu0 %v4268_v3  ;;  %3731 = vmatprep.subr.bf16.mxu1 %v4111_v1 }
 0x4d9   :  { %3706 = vmatpush1.bf16.msra.mxu0 %v4272_v10  ;;  %3733 = vmatpush3.bf16.msra.mxu1 %v4274_v12 }
 0x4da   :  { %3708 = vmatprep.subr.bf16.mxu0 %v4278_v14  ;;  %3734 = vmatprep.subr.bf16.mxu1 %v4111_v1 }
 0x4dd   :  { %3710 = vmatpush1.bf16.msra.mxu0 %v4282_v23  ;;  %3736 = vmatpush3.bf16.msra.mxu1 %v4284_v24 }
 0x4de   :  { %3712 = vmatprep.subr.bf16.mxu0 %v4288_v28  ;;  %3737 = vmatprep.subr.bf16.mxu1 %v4111_v1 }
 0x4e1   :  { %3714 = vmatpush1.bf16.msra.mxu0 %v4292_v34  ;;  %3739 = vmatpush3.bf16.msra.mxu1 %v4294_v37 }
 0x4e2   :  { %3716 = vmatprep.subr.bf16.mxu0 %v4298_v40  ;;  %3740 = vmatprep.subr.bf16.mxu1 %v4111_v1 }
 0x4e5   :  { %3718 = vmatpush1.bf16.msra.mxu0 %v4302_v46  ;;  %3742 = vmatpush3.bf16.msra.mxu1 %v4304_v48 }
 0x4e6   :  { %3744 = vmatprep.subr.bf16.mxu0 %v4197_v7  ;;  %3751 = vmatprep.subr.bf16.mxu1 %v4111_v1 }
 0x593   :  { %v1643_v17 = vpop.f32.mrb[8].mxu0  ;;  %v1714_v19 = vpop.f32.mrb[18].mxu1 }
 0x594   :  { %v3891_v21 = vadd.f32 %v1643_v17, %v4387_v9  ;;  %v1645_v22 = vpop.f32.mrb[9].mxu0  ;;  %v3184_v27 = vpop.f32.mrb[19].mxu1  ;;  %v1732_v49 = vadd.f32 %v4396_v41, %v1714_v19 }
 0x595   :  { %v3892_v30 = vadd.f32 %v1645_v22, %v4389_v18 }
 0x596   :  { %v2759_v29 = vmul.f32 -1.442695, %v3891_v21 }
 0x597   :  { %v2760_v31 = vmul.f32 -1.442695, %v3892_v30 }
 0x598   :  { %3969 = vpow2.f32 %v2759_v29 }
 0x599   :  { %3971 = vpow2.f32 %v2760_v31 }
 0x5a2   :  { %v3970_v32 = vpop.eup %3969 }
 0x5a3   :  { %v1722_v33 = vadd.f32 1.0, %v3970_v32  ;;  %v3972_v39 = vpop.eup %3971 }
 0x5a4   :  { %v1729_v43 = vadd.f32 1.0, %v3972_v39 }
 0x5a5   :  { %3973 = vrcp.f32 %v1722_v33 }
 0x5a6   :  { %3975 = vrcp.f32 %v1729_v43 }
 0x5af   :  { %v3974_v50 = vpop.eup %3973 }
 0x5b0   :  { %v1733_v57 = vmul.f32 %v3974_v50, %v1732_v49  ;;  %v3976_v59 = vpop.eup %3975 }
 0x5b1   :  { %v1736_v60 = vsub.f32 1.0, %v3976_v59  ;;  %v1738_v4 = vmul.f32 %v3976_v59, %v4584_v8  ;;  %v1892_v8 = vpop.f32.mrb[20].mxu1 }
 0x5b2   :  { %v1734_v58 = vadd.f32 %v1733_v57, %v1574_v55  ;;  %v3195_v51 = vpop.f32.mrb[21].mxu1  ;;  %v1893_v50 = vadd.f32 %v1892_v8, %v4398_v42 }
 0x5b4   :  { %3977 = vtanh.f32 %v1734_v58 }
 0x5be   :  { %v3978_v61 = vpop.eup %3977 }
 0x5bf   :  { %v1737_v0 = vmul.f32 %v3978_v61, %v1736_v60 }
 0x5c1   :  { %v1739_v5 = vadd.f32 %v1738_v4, %v1737_v0 }
 0x5c3   :  { %1741 = vst [vmem:[#allocation7 + $0x20] sm:$0xff] %v1739_v5  ;;  %v4644_v52 = vmul.f32 %v1747_v6, %v1739_v5  ;;  %v2066_v5 = vpop.permute.xlu0 %2065 }
 0x5c5   :  { %1961 = vmatmul.mubr.f32.vlgmr.msra.gmra.mrb[10].mxu0 %v4644_v52  ;;  %3229 = vmatmul.mubr.f32.vlgmr.msra.gmra.mrb[22].mxu1 %v4644_v52 }
 0x5c6   :  { %3746 = vmatpush1.bf16.msra.mxu0 %v4199_v11  ;;  %3753 = vmatpush3.bf16.msra.mxu1 %v4202_v15 }
 0x5c7   :  { %3748 = vmatprep.subr.bf16.mxu0 %v4204_v16  ;;  %3754 = vmatprep.subr.bf16.mxu1 %v4111_v1 }
 0x5c8   :  { %2138 = vmatprep.mubr.f32.mxu0 %v4112_v2  ;;  %3239 = vmatprep.mubr.msk.f32.mxu1 %vm4113_vm0, %v4112_v2 }
 0x5ca   :  { %3750 = vmatpush1.bf16.msra.mxu0 %v4207_v20  ;;  %3756 = vmatpush3.bf16.msra.mxu1 %v4214_v25 }
 0x5cb   :  { %3758 = vmatprep.subr.bf16.mxu0 %v4216_v26  ;;  %3789 = vmatprep.subr.bf16.mxu1 %v4111_v1 }
 0x5cd   :  { %2769 = vmatmul.mubr.msk.f32.vlgmr.msra.gmra.mrb[12].mxu0 %vm151_vm1, %v2768_v13  ;;  %3240 = vmatmul.mubr.msk.f32.vlgmr.msra.gmra.mrb[24].mxu1 %vm151_vm1, %v2768_v13 }
 0x5ce   :  { %3760 = vmatpush1.bf16.msra.mxu0 %v4228_v35  ;;  %3791 = vmatpush3.bf16.msra.mxu1 %v4230_v36 }
 0x5cf   :  { %3762 = vmatprep.subr.bf16.mxu0 %v4233_v38  ;;  %3792 = vmatprep.subr.bf16.mxu1 %v4111_v1 }
 0x5d0   :  { %2279 = vmatprep.mubr.f32.mxu0 %v4112_v2  ;;  %3274 = vmatprep.mubr.msk.f32.mxu1 %vm4113_vm0, %v4112_v2 }
 0x5d2   :  { %3764 = vmatpush1.bf16.msra.mxu0 %v4239_v44  ;;  %3794 = vmatpush3.bf16.msra.mxu1 %v4241_v45 }
 0x5d3   :  { %3766 = vmatprep.subr.bf16.mxu0 %v4245_v47  ;;  %3795 = vmatprep.subr.bf16.mxu1 %v4111_v1 }
 0x5d6   :  { %3768 = vmatpush1.bf16.msra.mxu0 %v4252_v53  ;;  %3797 = vmatpush3.bf16.msra.mxu1 %v4254_v54 }
 0x5d7   :  { %3770 = vmatprep.subr.bf16.mxu0 %v4258_v56  ;;  %3798 = vmatprep.subr.bf16.mxu1 %v4111_v1 }
 0x5da   :  { %3772 = vmatpush1.bf16.msra.mxu0 %v4262_v62  ;;  %3800 = vmatpush3.bf16.msra.mxu1 %v4264_v63 }
 0x5db   :  { %3774 = vmatprep.subr.bf16.mxu0 %v4268_v3  ;;  %3801 = vmatprep.subr.bf16.mxu1 %v4111_v1 }
 0x5de   :  { %3776 = vmatpush1.bf16.msra.mxu0 %v4272_v10  ;;  %3803 = vmatpush3.bf16.msra.mxu1 %v4274_v12 }
 0x5df   :  { %3778 = vmatprep.subr.bf16.mxu0 %v4278_v14  ;;  %3804 = vmatprep.subr.bf16.mxu1 %v4111_v1 }
 0x5e2   :  { %3780 = vmatpush1.bf16.msra.mxu0 %v4282_v23  ;;  %3806 = vmatpush3.bf16.msra.mxu1 %v4284_v24 }
 0x5e3   :  { %3782 = vmatprep.subr.bf16.mxu0 %v4288_v28  ;;  %3807 = vmatprep.subr.bf16.mxu1 %v4111_v1 }
 0x5e6   :  { %3784 = vmatpush1.bf16.msra.mxu0 %v4292_v34  ;;  %3809 = vmatpush3.bf16.msra.mxu1 %v4294_v37 }
 0x5e7   :  { %3786 = vmatprep.subr.bf16.mxu0 %v4298_v40  ;;  %3810 = vmatprep.subr.bf16.mxu1 %v4111_v1 }
 0x5ea   :  { %3788 = vmatpush1.bf16.msra.mxu0 %v4302_v46  ;;  %3812 = vmatpush3.bf16.msra.mxu1 %v4304_v48 }
 0x5eb   :  { %3814 = vmatprep.subr.bf16.mxu0 %v4197_v7  ;;  %3821 = vmatprep.subr.bf16.mxu1 %v4111_v1 }
 0x698   :  { %v1962_v17 = vpop.f32.mrb[10].mxu0  ;;  %v2033_v19 = vpop.f32.mrb[22].mxu1 }
 0x699   :  { %v3893_v21 = vadd.f32 %v1962_v17, %v4387_v9  ;;  %v1964_v22 = vpop.f32.mrb[11].mxu0  ;;  %v3230_v27 = vpop.f32.mrb[23].mxu1  ;;  %v2051_v7 = vadd.f32 %v4396_v41, %v2033_v19 }
 0x69a   :  { %v3894_v30 = vadd.f32 %v1964_v22, %v4389_v18 }
 0x69b   :  { %v2765_v29 = vmul.f32 -1.442695, %v3893_v21 }
 0x69c   :  { %v2766_v31 = vmul.f32 -1.442695, %v3894_v30  ;;  %v4009_v30 = vld [vmem:[%s4805_s6] ss:$0 sm:$0xff]  ;;  %s4054_s6 = scalar_lea.vmem %s2706_s19, 1024 }
 0x69d   :  { %3979 = vpow2.f32 %v2765_v29  ;;  %p4055_p2 = scmp.ne.s32.totalorder %s2706_s19, %s4054_s6  ;;  %p4060_p4 = scmp.lt.s32.totalorder %s4054_s6, %s4054_s6 }
 0x69e   :  { %3981 = vpow2.f32 %v2766_v31 }
 0x69f   :  { %p4061_p5 = por %p4060_p4, %p4059_p3 }
 0x6a1   :  { %p4062_p6 = pnand %p4061_p5, %p4055_p2 }
 0x6a7   :  { %v3980_v32 = vpop.eup %3979 }
 0x6a8   :  { %v2041_v33 = vadd.f32 1.0, %v3980_v32  ;;  %v3982_v39 = vpop.eup %3981 }
 0x6a9   :  { %v2048_v43 = vadd.f32 1.0, %v3982_v39 }
 0x6aa   :  { %3983 = vrcp.f32 %v2041_v33 }
 0x6ab   :  { %3985 = vrcp.f32 %v2048_v43 }
 0x6b4   :  { %v3984_v49 = vpop.eup %3983 }
 0x6b5   :  { %v2052_v55 = vmul.f32 %v3984_v49, %v2051_v7  ;;  %v3986_v58 = vpop.eup %3985 }
 0x6b6   :  { %v2055_v59 = vsub.f32 1.0, %v3986_v58  ;;  %v2057_v0 = vmul.f32 %v3986_v58, %v4644_v52 }
 0x6b7   :  { %v2053_v57 = vadd.f32 %v2052_v55, %v1893_v50 }
 0x6b9   :  { %3987 = vtanh.f32 %v2053_v57 }
 0x6c3   :  { %v3988_v60 = vpop.eup %3987 }
 0x6c4   :  { %v2056_v61 = vmul.f32 %v3988_v60, %v2055_v59 }
 0x6c6   :  { %v2058_v4 = vadd.f32 %v2057_v0, %v2056_v61 }
 0x6c8   :  { %2060 = vst [vmem:[#allocation7 + $0x28] sm:$0xff] %v2058_v4  ;;  %v4704_v6 = vmul.f32 %v2066_v5, %v2058_v4 }
 0x6ca   :  { %2280 = vmatmul.mubr.f32.vlgmr.msra.gmra.mrb[12].mxu0 %v4704_v6  ;;  %3275 = vmatmul.mubr.f32.vlgmr.msra.gmra.mrb[26].mxu1 %v4704_v6 }
 0x6cb   :  { %3816 = vmatpush1.bf16.msra.mxu0 %v4199_v11  ;;  %3823 = vmatpush3.bf16.msra.mxu1 %v4202_v15  ;;  %v2211_v11 = vpop.f32.mrb[24].mxu1  ;;  %v2774_v15 = vld [vmem:[%s4799_s0 + $0x38] sm:$0xff] }
 0x6cc   :  { %3818 = vmatprep.subr.bf16.mxu0 %v4204_v16  ;;  %3824 = vmatprep.subr.bf16.mxu1 %v4111_v1  ;;  %v3241_v52 = vpop.f32.mrb[25].mxu1 }
 0x6cd   :  { %2457 = vmatprep.mubr.f32.mxu0 %v4112_v2  ;;  %3285 = vmatprep.mubr.msk.f32.mxu1 %vm4113_vm0, %v4112_v2 }
 0x6cf   :  { %3820 = vmatpush1.bf16.msra.mxu0 %v4207_v20  ;;  %3826 = vmatpush3.bf16.msra.mxu1 %v4214_v25 }
 0x6d0   :  { %3828 = vmatprep.subr.bf16.mxu0 %v4216_v26  ;;  %3859 = vmatprep.subr.bf16.mxu1 %v4111_v1 }
 0x6d2   :  { %2775 = vmatmul.mubr.msk.f32.vlgmr.msra.gmra.mrb[14].mxu0 %vm151_vm1, %v2774_v15  ;;  %3286 = vmatmul.mubr.msk.f32.vlgmr.msra.gmra.mrb[28].mxu1 %vm151_vm1, %v2774_v15 }
 0x6d3   :  { %3830 = vmatpush1.bf16.msra.mxu0 %v4228_v35  ;;  %3861 = vmatpush3.bf16.msra.mxu1 %v4230_v36 }
 0x6d4   :  { %3832 = vmatprep.subr.bf16.mxu0 %v4233_v38  ;;  %3862 = vmatprep.subr.bf16.mxu1 %v4111_v1 }
 0x6d5   :  { %2598 = vmatprep.mubr.f32.mxu0 %v4112_v2  ;;  %3320 = vmatprep.mubr.msk.f32.mxu1 %vm4113_vm0, %v4112_v2 }
 0x6d7   :  { %3834 = vmatpush1.bf16.msra.mxu0 %v4239_v44  ;;  %3864 = vmatpush3.bf16.msra.mxu1 %v4241_v45 }
 0x6d8   :  { %3836 = vmatprep.subr.bf16.mxu0 %v4245_v47  ;;  %3865 = vmatprep.subr.bf16.mxu1 %v4111_v1 }
 0x6db   :  { %3838 = vmatpush1.bf16.msra.mxu0 %v4252_v53  ;;  %3867 = vmatpush3.bf16.msra.mxu1 %v4254_v54 }
 0x6dc   :  { %3840 = vmatprep.subr.bf16.mxu0 %v4258_v56  ;;  %3868 = vmatprep.subr.bf16.mxu1 %v4111_v1  ;;  %v2212_v56 = vadd.f32 %v2211_v11, %v4398_v42 }
 0x6df   :  { %3842 = vmatpush1.bf16.msra.mxu0 %v4262_v62  ;;  %3870 = vmatpush3.bf16.msra.mxu1 %v4264_v63 }
 0x6e0   :  { %3844 = vmatprep.subr.bf16.mxu0 %v4268_v3  ;;  %3871 = vmatprep.subr.bf16.mxu1 %v4111_v1 }
 0x6e3   :  { %3846 = vmatpush1.bf16.msra.mxu0 %v4272_v10  ;;  %3873 = vmatpush3.bf16.msra.mxu1 %v4274_v12 }
 0x6e4   :  { %3848 = vmatprep.subr.bf16.mxu0 %v4278_v14  ;;  %3874 = vmatprep.subr.bf16.mxu1 %v4111_v1 }
 0x6e7   :  { %3850 = vmatpush1.bf16.msra.mxu0 %v4282_v23  ;;  %3876 = vmatpush3.bf16.msra.mxu1 %v4284_v24 }
 0x6e8   :  { %3852 = vmatprep.subr.bf16.mxu0 %v4288_v28  ;;  %3877 = vmatprep.subr.bf16.mxu1 %v4111_v1  ;;  %v2385_v28 = vpop.permute.xlu1 %2384 }
 0x6eb   :  { %3854 = vmatpush1.bf16.msra.mxu0 %v4292_v34  ;;  %3879 = vmatpush3.bf16.msra.mxu1 %v4294_v37 }
 0x6ec   :  { %3856 = vmatprep.subr.bf16.mxu0 %v4298_v40  ;;  %3880 = vmatprep.subr.bf16.mxu1 %v4111_v1 }
 0x6ef   :  { %3858 = vmatpush1.bf16.msra.mxu0 %v4302_v46  ;;  %3882 = vmatpush3.bf16.msra.mxu1 %v4304_v48 }
 0x79d   :  { %v2281_v2 = vpop.f32.mrb[12].mxu0  ;;  %v2352_v16 = vpop.f32.mrb[26].mxu1 }
 0x79e   :  { %v3895_v20 = vadd.f32 %v2281_v2, %v4387_v9  ;;  %v2283_v25 = vpop.f32.mrb[13].mxu0  ;;  %v3276_v26 = vpop.f32.mrb[27].mxu1  ;;  %v2370_v53 = vadd.f32 %v4396_v41, %v2352_v16 }
 0x79f   :  { %v3896_v36 = vadd.f32 %v2283_v25, %v4389_v18 }
 0x7a0   :  { %v2771_v35 = vmul.f32 -1.442695, %v3895_v20 }
 0x7a1   :  { %v2772_v38 = vmul.f32 -1.442695, %v3896_v36 }
 0x7a2   :  { %3989 = vpow2.f32 %v2771_v35 }
 0x7a3   :  { %3991 = vpow2.f32 %v2772_v38 }
 0x7a5   :  { %v2530_v37 = vpop.f32.mrb[28].mxu1 }
 0x7a6   :  { %v3287_v40 = vpop.f32.mrb[29].mxu1 }
 0x7ac   :  { %v3990_v44 = vpop.eup %3989 }
 0x7ad   :  { %v2360_v45 = vadd.f32 1.0, %v3990_v44  ;;  %v3992_v1 = vpop.eup %3991 }
 0x7ae   :  { %v2367_v47 = vadd.f32 1.0, %v3992_v1 }
 0x7af   :  { %3993 = vrcp.f32 %v2360_v45 }
 0x7b0   :  { %3995 = vrcp.f32 %v2367_v47 }
 0x7b9   :  { %v3994_v54 = vpop.eup %3993 }
 0x7ba   :  { %v2371_v62 = vmul.f32 %v3994_v54, %v2370_v53  ;;  %v3996_v3 = vpop.eup %3995 }
 0x7bb   :  { %v2374_v10 = vsub.f32 1.0, %v3996_v3  ;;  %v2376_v23 = vmul.f32 %v3996_v3, %v4704_v6 }
 0x7bc   :  { %v2372_v63 = vadd.f32 %v2371_v62, %v2212_v56 }
 0x7be   :  { %3997 = vtanh.f32 %v2372_v63 }
 0x7c8   :  { %v3998_v12 = vpop.eup %3997 }
 0x7c9   :  { %v2375_v14 = vmul.f32 %v3998_v12, %v2374_v10 }
 0x7cb   :  { %v2377_v24 = vadd.f32 %v2376_v23, %v2375_v14 }
 0x7cd   :  { %2379 = vst [vmem:[#allocation7 + $0x30] sm:$0xff] %v2377_v24  ;;  %v2387_v34 = vmul.f32 %v2385_v28, %v2377_v24 }
 0x7cf   :  { %2599 = vmatmul.mubr.f32.vlgmr.msra.gmra.mrb[14].mxu0 %v2387_v34  ;;  %3321 = vmatmul.mubr.f32.vlgmr.msra.gmra.mrb[30].mxu1 %v2387_v34 }
 0x8a2   :  { %v2600_v46 = vpop.f32.mrb[14].mxu0  ;;  %v2671_v48 = vpop.f32.mrb[30].mxu1 }
 0x8a3   :  { %v3897_v41 = vadd.f32 %v2600_v46, %v4387_v9  ;;  %v2602_v8 = vpop.f32.mrb[15].mxu0  ;;  %v3322_v51 = vpop.f32.mrb[31].mxu1  ;;  %v2689_v31 = vadd.f32 %v4009_v30, %v2671_v48  ;;  %v2531_v9 = vadd.f32 %v2530_v37, %v4398_v42 }
 0x8a4   :  { %v3898_v17 = vadd.f32 %v2602_v8, %v4389_v18 }
 0x8a5   :  { %v2777_v13 = vmul.f32 -1.442695, %v3897_v41 }
 0x8a6   :  { %v2778_v19 = vmul.f32 -1.442695, %v3898_v17 }
 0x8a7   :  { %3999 = vpow2.f32 %v2777_v13 }
 0x8a8   :  { %4001 = vpow2.f32 %v2778_v19 }
 0x8b1   :  { %v4000_v21 = vpop.eup %3999 }
 0x8b2   :  { %v2679_v22 = vadd.f32 1.0, %v4000_v21  ;;  %v4002_v27 = vpop.eup %4001 }
 0x8b3   :  { %v2686_v29 = vadd.f32 1.0, %v4002_v27 }
 0x8b4   :  { %4003 = vrcp.f32 %v2679_v22 }
 0x8b5   :  { %4005 = vrcp.f32 %v2686_v29 }
 0x8be   :  { %v4004_v32 = vpop.eup %4003 }
 0x8bf   :  { %v2690_v33 = vmul.f32 %v4004_v32, %v2689_v31  ;;  %v4006_v18 = vpop.eup %4005 }
 0x8c0   :  { %v2693_v43 = vsub.f32 1.0, %v4006_v18  ;;  %v2695_v50 = vmul.f32 %v4006_v18, %v2387_v34 }
 0x8c1   :  { %v2691_v39 = vadd.f32 %v2690_v33, %v2531_v9 }
 0x8c3   :  { %4007 = vtanh.f32 %v2691_v39 }
 0x8cd   :  { %v4008_v7 = vpop.eup %4007 }
 0x8ce   :  { %v2694_v49 = vmul.f32 %v4008_v7, %v2693_v43 }
 0x8d0   :  { %v2696_v55 = vadd.f32 %v2695_v50, %v2694_v49 }
 0x8d2   :  { %2698 = vst [vmem:[#allocation7 + $0x38] sm:$0xff] %v2696_v55  ;;  %2699 = vst [vmem:[#allocation8] sm:$0xff] %v2696_v55 }
 0x8d3   :  { %4065 = shalt.err (!%p4062_p6)
}
 0x8d4   :  { %s4066_s24 = scalar_lea.hbm %s4806_s7, 1024 }
 0x8d5   :  { %p4067_p7 = scmp.ne.s32.totalorder %s4806_s7, %s4066_s24  ;;  %p4070_p8 = scmp.lt.u32.totalorder %s4066_s24, %s4806_s7 }
 0x8d7   :  { %p4072_p9 = pnand %p4070_p8, %p4067_p7 }
 0x8d9   :  { %4075 = shalt.err (!%p4072_p9)
}
 0x8da   :  { %s4116_s3 = smov 128   ;;  %s4117_s1 = smov 8  }
 0x8db   :  { %2711 = dma.vmem_to_hbm [thread:$0]  %s2706_s19, 1024, %s4806_s7, [#allocation4], %s4116_s3, %s4116_s3, %s4117_s1  }
 0x8dc   :  { %s4076_s30 = scalar_lea.vmem %s4768_s21, 128  ;;  %p4081_p11 = scmp.lt.s32.totalorder %s4768_s21, %s4768_s21 }
 0x8dd   :  { %p4077_p10 = scmp.ne.s32.totalorder %s4768_s21, %s4076_s30  ;;  %p4082_p12 = scmp.lt.s32.totalorder %s4076_s30, %s4076_s30 }
 0x8df   :  { %p4083_p13 = por %p4082_p12, %p4081_p11 }
 0x8e1   :  { %p4084_p0 = pnand %p4083_p13, %p4077_p10 }
 0x8e3   :  { %4087 = shalt.err (!%p4084_p0)
}
 0x8e4   :  { %s4088_s10 = scalar_lea.hbm %s4807_s8, 128 }
 0x8e5   :  { %p4089_p1 = scmp.ne.s32.totalorder %s4807_s8, %s4088_s10  ;;  %p4092_p2 = scmp.lt.u32.totalorder %s4088_s10, %s4807_s8 }
 0x8e7   :  { %p4094_p3 = pnand %p4092_p2, %p4089_p1 }
 0x8e9   :  { %4097 = shalt.err (!%p4094_p3)
}
 0x8ea   :  { %2721 = dma.vmem_to_hbm [thread:$0]  %s4768_s21, 128, %s4807_s8, [#allocation9]  }
 0x8eb   :  { %4102 = dma.done.wait [#allocation4], 1024  }
 0x8ec   :  { %4103 = vsyncadd [#allocation4], 4294966272 }
 0x8ed   :  { %4104 = dma.done.wait [#allocation9], 128  }
 0x8ee   :  { %4105 = vsyncadd [#allocation9], 4294967168 }
 0x8ef   :  { %2728 = vsyncpa [#allocation3], 1 }
 0x8f0   :  { %2729 = vsyncpa [#allocation6], 1 }
 0x8f1   :  { %2730 = vsyncpa [#allocation4], 1 }
 0x8f2   :  { %2731 = vsyncpa [#allocation9], 1 }

</bundles_post_ra>
